<compile_context>
chip_gen: v7x
topology: tpu7x:2x2x1
jax: 0.10.0
libtpu: 0.0.40
codegen_flags: <defaults>
</compile_context>

<pallas_src>
import numpy as np
import jax
import jax.numpy as jnp
from jax.experimental import pallas as pl
from jax.experimental.pallas import tpu as pltpu


_VMEM = pl.BlockSpec(memory_space=pltpu.MemorySpace.VMEM)
_ANY = pl.BlockSpec(memory_space=pl.ANY)
_LANES = 128        # lane-dense padded classifier width
_EPS = 1e-5

# Fused bias-slab column offsets (all multiples of 128 -> lane-aligned slices).
_B1_OFF, _B1_LEN = 0, 5 * 64      # stage-1 bias (320)
_B2_OFF, _B2_LEN = 384, 3 * 128   # stage-2 bias (384)
_B3_OFF, _B3_LEN = 768, 256       # stage-3 bias (256)
_P1_OFF, _P1_LEN = 1024, 128      # projector1 bias
_P2_OFF, _P2_LEN = 1152, 128      # projector2 bias (padded)
_BIAS_W = 1280


# ---------------------------------------------------------------------------
# Fused Pallas kernel
# ---------------------------------------------------------------------------

def _make_fused_kernel(B):
    """Spatial geometry fixed by the module: 7 -> 5 -> 3 -> 1 (3x3, valid)."""
    M = B * 8   # batch blocks padded to the 8-row sublane tile

    def kernel(x_ref, w1_ref, bias_ref, w2_hbm, w3_hbm, pw_hbm,
               o_ref, a1_ref, a2_ref, w2_v, w3_v, pw_v, sems):
        # --- overlap later-stage weight DMA with stage-1/2 compute ----------
        cp_w2 = pltpu.make_async_copy(w2_hbm, w2_v, sems.at[0])
        cp_w3 = pltpu.make_async_copy(w3_hbm, w3_v, sems.at[1])
        cp_pw = pltpu.make_async_copy(pw_hbm, pw_v, sems.at[2])
        cp_w2.start()
        cp_w3.start()
        cp_pw.start()

        # Zero the trailing pad block of each activation slab so the dy-shifted
        # slices below never read uninitialized VMEM (only garbage output rows
        # depend on it, but keep everything finite).
        a1_ref[M:, :] = jnp.zeros((8, _B1_LEN), jnp.bfloat16)
        a2_ref[M:, :] = jnp.zeros((8, _B2_LEN), jnp.bfloat16)

        def conv_stage(in_ref, w_ref, bias):
            # Whole-slab banded matmul: 3 MXU issues per stage (not 3*B).
            acc = jnp.dot(in_ref[0:M, :], w_ref[0],
                          preferred_element_type=jnp.float32)
            acc = acc + jnp.dot(in_ref[1:M + 1, :], w_ref[1],
                                preferred_element_type=jnp.float32)
            acc = acc + jnp.dot(in_ref[2:M + 2, :], w_ref[2],
                                preferred_element_type=jnp.float32)
            return jnp.maximum(acc + bias, 0.0)          # f32 epilogue (v5e-safe)

        # Stage 1: (M, 21) @ (21, 320) -> a1     (weights came via normal DMA)
        a1_ref[0:M, :] = conv_stage(
            x_ref, w1_ref, bias_ref[:, _B1_OFF:_B1_OFF + _B1_LEN]
        ).astype(a1_ref.dtype)

        # Stage 2: (M, 320) @ (320, 384) -> a2
        cp_w2.wait()
        a2_ref[0:M, :] = conv_stage(
            a1_ref, w2_v, bias_ref[:, _B2_OFF:_B2_OFF + _B2_LEN]
        ).astype(a2_ref.dtype)

        # Stage 3: (M, 384) @ (384, 256) -> features (kept in registers).
        cp_w3.wait()
        feat = conv_stage(a2_ref, w3_v, bias_ref[:, _B3_OFF:_B3_OFF + _B3_LEN])

        # TODO(synk): training-mode Dropout(p=0.1) masking not implemented;
        # eval-mode dropout is the identity.

        # MLP head on the full (M, 256) slab (only row b*8 per block is valid).
        cp_pw.wait()
        h = jnp.dot(feat.astype(pw_v.dtype), pw_v[0:256, :],
                    preferred_element_type=jnp.float32)
        h = jnp.maximum(h + bias_ref[:, _P1_OFF:_P1_OFF + _P1_LEN], 0.0)
        logits = jnp.dot(h.astype(pw_v.dtype), pw_v[256:384, :],
                         preferred_element_type=jnp.float32)
        logits = logits + bias_ref[:, _P2_OFF:_P2_OFF + _P2_LEN]
        o_ref[...] = logits.astype(o_ref.dtype)

    return kernel


# ---------------------------------------------------------------------------
# One-time host-side parameter transform (NOT in the jitted forward path)
# ---------------------------------------------------------------------------

def _banded_conv_weights_np(w, scale, w_in):
    """Fold BN scale into the conv weight and expand into 3 row-banded matmul
    matrices: band[dy][(xo+dx)*Cin + ci, xo*Cout + co] = w[co,ci,dy,dx]*scale[co]."""
    cout, cin, kh, kw = w.shape
    wo = w_in - kw + 1
    wt = np.transpose(w, (2, 3, 1, 0)) * scale[None, None, None, :]  # (kh,kw,Cin,Cout)
    band = np.zeros((kh, w_in * cin, wo * cout), np.float32)
    for dy in range(kh):
        for dx in range(kw):
            for xo in range(wo):
                band[dy, (xo + dx) * cin:(xo + dx + 1) * cin,
                     xo * cout:(xo + 1) * cout] = wt[dy, dx]
    return band


def prepare_params(params, eps=_EPS):
    """Host-side (numpy) prep: banded weights + BN fold + fused bias slab +
    stacked MLP weights.  Call once; pass the result into simplenet_forward."""
    def stage(p, w_in):
        w = np.asarray(p["w"], np.float32)
        scale = np.asarray(p["gamma"], np.float32) / np.sqrt(
            np.asarray(p["var"], np.float32) + eps)
        bias = np.asarray(p["beta"], np.float32) + (
            np.asarray(p["b"], np.float32) - np.asarray(p["mean"], np.float32)) * scale
        band = _banded_conv_weights_np(w, scale, w_in)
        wo = w_in - 2
        return band, np.tile(bias, wo)

    band1, bias1 = stage(params["step1"], 7)   # (3, 21, 320),  (320,)
    band2, bias2 = stage(params["step2"], 5)   # (3, 320, 384), (384,)
    band3, bias3 = stage(params["step3"], 3)   # (3, 384, 256), (256,)

    # NOTE: synthetic proj weights are (in_features, out_features); real
    # PyTorch nn.Linear weights are (out, in) and must be transposed on load.
    num_classes = int(np.asarray(params["proj2_w"]).shape[1])
    pw1 = np.asarray(params["proj1_w"], np.float32)            # (256, 128)
    pw2 = np.zeros((128, _LANES), np.float32)
    pw2[:, :num_classes] = np.asarray(params["proj2_w"], np.float32)
    pw = np.concatenate([pw1, pw2], axis=0)                    # (384, 128)

    biases = np.zeros((1, _BIAS_W), np.float32)
    biases[0, _B1_OFF:_B1_OFF + _B1_LEN] = bias1
    biases[0, _B2_OFF:_B2_OFF + _B2_LEN] = bias2
    biases[0, _B3_OFF:_B3_OFF + _B3_LEN] = bias3
    biases[0, _P1_OFF:_P1_OFF + 128] = np.asarray(params["proj1_b"], np.float32)
    biases[0, _P2_OFF:_P2_OFF + num_classes] = np.asarray(params["proj2_b"], np.float32)

    prep = {
        "w1": jnp.asarray(band1, jnp.bfloat16),
        "w2": jnp.asarray(band2, jnp.bfloat16),
        "w3": jnp.asarray(band3, jnp.bfloat16),
        "pw": jnp.asarray(pw, jnp.bfloat16),
        "biases": jnp.asarray(biases, jnp.float32),
    }
    return prep, num_classes


# ---------------------------------------------------------------------------
# Forward (reproduces SimpleNet.forward, eval mode)
# ---------------------------------------------------------------------------

def simplenet_forward(x_nchw, prep, *, num_classes):
    B = x_nchw.shape[0]
    # 7x7 input is implied by Linear(in_features=256): 7 -> 5 -> 3 -> 1.
    assert x_nchw.shape[1:] == (3, 7, 7), x_nchw.shape
    M = B * 8

    # NCHW -> NHWC -> per-batch 8-row blocks of a 2-D (rows, W*C) slab, plus
    # one trailing all-zero block so in-kernel dy-shifted slices stay in bounds.
    x = jnp.transpose(x_nchw, (0, 2, 3, 1)).reshape(B, 7, 7 * 3)
    x = jnp.pad(x, ((0, 1), (0, 1), (0, 0))).reshape((B + 1) * 8, 7 * 3)
    x = x.astype(jnp.bfloat16)

    flops = 2 * M * (3 * 21 * 320 + 3 * 320 * 384 + 3 * 384 * 256
                     + 256 * 128 + 128 * 128)
    bytes_accessed = (x.size * 2 + prep["w1"].size * 2 + prep["w2"].size * 2
                      + prep["w3"].size * 2 + prep["pw"].size * 2
                      + prep["biases"].size * 4 + M * _LANES * 4)

    out_padded = pl.pallas_call(
        _make_fused_kernel(B),
        out_shape=jax.ShapeDtypeStruct((M, _LANES), jnp.float32),
        in_specs=[_VMEM, _VMEM, _VMEM, _ANY, _ANY, _ANY],
        out_specs=_VMEM,
        scratch_shapes=[
            pltpu.VMEM((M + 8, _B1_LEN), jnp.bfloat16),      # stage-1 activations
            pltpu.VMEM((M + 8, _B2_LEN), jnp.bfloat16),      # stage-2 activations
            pltpu.VMEM((3, _B1_LEN, _B2_LEN), jnp.bfloat16),  # w2 band landing buffer
            pltpu.VMEM((3, _B2_LEN, 256), jnp.bfloat16),      # w3 band landing buffer
            pltpu.VMEM((384, _LANES), jnp.bfloat16),          # stacked MLP weights
            pltpu.SemaphoreType.DMA((3,)),
        ],
        cost_estimate=pl.CostEstimate(flops=flops, transcendentals=0,
                                      bytes_accessed=bytes_accessed),
    )(x, prep["w1"], prep["biases"], prep["w2"], prep["w3"], prep["pw"])

    # Row b*8 holds the (1x1 spatial, 256-channel) result for batch b.
    return out_padded.reshape(B, 8, _LANES)[:, 0, :num_classes]


# ---------------------------------------------------------------------------
# Pure-JAX reference (f32) for a sanity check
# ---------------------------------------------------------------------------

def _reference_forward(x_nchw, params, eps=_EPS):
    x = x_nchw
    for name in ("step1", "step2", "step3"):
        p = params[name]
        x = jax.lax.conv_general_dilated(
            x, p["w"], window_strides=(1, 1), padding="VALID",
            dimension_numbers=("NCHW", "OIHW", "NCHW"))
        x = x + p["b"][None, :, None, None]
        scale = p["gamma"] / jnp.sqrt(p["var"] + eps)
        x = scale[None, :, None, None] * (x - p["mean"][None, :, None, None]) \
            + p["beta"][None, :, None, None]
        x = jnp.maximum(x, 0.0)
    feat = x.reshape(x.shape[0], -1)
    h = jnp.maximum(feat @ params["proj1_w"] + params["proj1_b"], 0.0)
    return h @ params["proj2_w"] + params["proj2_b"]


# ---------------------------------------------------------------------------
# Deterministic synthetic parameters (shapes from SimpleNet.__init__)
# ---------------------------------------------------------------------------

def init_params(key, num_classes=2):
    def conv_block(key, cin, cout):
        k = jax.random.split(key, 6)
        fan_in = cin * 3 * 3
        return {
            "w": jax.random.normal(k[0], (cout, cin, 3, 3), jnp.float32)
                 * (2.0 / fan_in) ** 0.5,
            "b": jax.random.normal(k[1], (cout,), jnp.float32) * 0.01,
            "gamma": 1.0 + 0.1 * jax.random.normal(k[2], (cout,), jnp.float32),
            "beta": 0.1 * jax.random.normal(k[3], (cout,), jnp.float32),
            "mean": 0.1 * jax.random.normal(k[4], (cout,), jnp.float32),
            "var": 1.0 + 0.1 * jax.random.uniform(k[5], (cout,), jnp.float32),
        }

    keys = jax.random.split(key, 7)
    return {
        "step1": conv_block(keys[0], 3, 64),
        "step2": conv_block(keys[1], 64, 128),
        "step3": conv_block(keys[2], 128, 256),
        "proj1_w": jax.random.normal(keys[3], (256, 128), jnp.float32) * (1.0 / 256) ** 0.5,
        "proj1_b": 0.01 * jax.random.normal(keys[4], (128,), jnp.float32),
        "proj2_w": jax.random.normal(keys[5], (128, num_classes), jnp.float32) * (1.0 / 128) ** 0.5,
        "proj2_b": 0.01 * jax.random.normal(keys[6], (num_classes,), jnp.float32),
    }


# ---------------------------------------------------------------------------
# Main
# ---------------------------------------------------------------------------

if __name__ == "__main__":
    key = jax.random.PRNGKey(0)
    pkey, xkey = jax.random.split(key)

    params = init_params(pkey, num_classes=2)
    prep, num_classes = prepare_params(params)         # one-time host-side prep
    x = jax.random.normal(xkey, (2, 3, 7, 7), jnp.float32)  # NCHW like PyTorch

    fwd = jax.jit(simplenet_forward, static_argnames=("num_classes",))
    out = jax.block_until_ready(fwd(x, prep, num_classes=num_classes))

    assert out.shape == (2, 2), out.shape
    assert bool(jnp.all(jnp.isfinite(out)))

    # Sanity-check against a pure-JAX f32 reference (bf16 matmul inputs give
    # ~1e-2-level deviation; tolerance set accordingly).
    ref = jax.jit(_reference_forward)(x, params)
    assert float(jnp.max(jnp.abs(out - ref))) < 0.25

    print("KERNEL_OK")
</pallas_src>

<mosaic_0001>
module attributes {stable_mosaic.version = 11 : i64} {
  func.func @kernel(%arg0: memref<24x21xbf16, #tpu.memory_space<vmem>>, %arg1: memref<3x21x320xbf16, #tpu.memory_space<vmem>>, %arg2: memref<1x1280xf32, #tpu.memory_space<vmem>>, %arg3: memref<3x320x384xbf16, #tpu.memory_space<any>>, %arg4: memref<3x384x256xbf16, #tpu.memory_space<any>>, %arg5: memref<384x128xbf16, #tpu.memory_space<any>>, %arg6: memref<16x128xf32, #tpu.memory_space<vmem>>, %arg7: memref<24x320xbf16, #tpu.memory_space<vmem>>, %arg8: memref<24x384xbf16, #tpu.memory_space<vmem>>, %arg9: memref<3x320x384xbf16, #tpu.memory_space<vmem>>, %arg10: memref<3x384x256xbf16, #tpu.memory_space<vmem>>, %arg11: memref<384x128xbf16, #tpu.memory_space<vmem>>, %arg12: memref<3x!tpu.dma_semaphore, #tpu.memory_space<semaphore_mem>>) attributes {dimension_semantics = [], scalar_prefetch = 0 : i64, scratch_operands = 6 : i64, tpu.core_type = #tpu.core_type<tc>} {
    %c0_i32 = arith.constant 0 : i32
    %0 = tpu.memref_slice %arg12[%c0_i32] : memref<3x!tpu.dma_semaphore, #tpu.memory_space<semaphore_mem>> -> memref<1x!tpu.dma_semaphore, #tpu.memory_space<semaphore_mem>>
    %1 = tpu.memref_squeeze %0 : memref<1x!tpu.dma_semaphore, #tpu.memory_space<semaphore_mem>> -> memref<!tpu.dma_semaphore, #tpu.memory_space<semaphore_mem>>
    tpu.enqueue_dma source(%arg3 : memref<3x320x384xbf16, #tpu.memory_space<any>>) target(%arg9 : memref<3x320x384xbf16, #tpu.memory_space<vmem>>) target_semaphore(%1 : memref<!tpu.dma_semaphore, #tpu.memory_space<semaphore_mem>>)
    %c1_i32 = arith.constant 1 : i32
    %2 = tpu.memref_slice %arg12[%c1_i32] : memref<3x!tpu.dma_semaphore, #tpu.memory_space<semaphore_mem>> -> memref<1x!tpu.dma_semaphore, #tpu.memory_space<semaphore_mem>>
    %3 = tpu.memref_squeeze %2 : memref<1x!tpu.dma_semaphore, #tpu.memory_space<semaphore_mem>> -> memref<!tpu.dma_semaphore, #tpu.memory_space<semaphore_mem>>
    tpu.enqueue_dma source(%arg4 : memref<3x384x256xbf16, #tpu.memory_space<any>>) target(%arg10 : memref<3x384x256xbf16, #tpu.memory_space<vmem>>) target_semaphore(%3 : memref<!tpu.dma_semaphore, #tpu.memory_space<semaphore_mem>>)
    %c2_i32 = arith.constant 2 : i32
    %4 = tpu.memref_slice %arg12[%c2_i32] : memref<3x!tpu.dma_semaphore, #tpu.memory_space<semaphore_mem>> -> memref<1x!tpu.dma_semaphore, #tpu.memory_space<semaphore_mem>>
    %5 = tpu.memref_squeeze %4 : memref<1x!tpu.dma_semaphore, #tpu.memory_space<semaphore_mem>> -> memref<!tpu.dma_semaphore, #tpu.memory_space<semaphore_mem>>
    tpu.enqueue_dma source(%arg5 : memref<384x128xbf16, #tpu.memory_space<any>>) target(%arg11 : memref<384x128xbf16, #tpu.memory_space<vmem>>) target_semaphore(%5 : memref<!tpu.dma_semaphore, #tpu.memory_space<semaphore_mem>>)
    %cst = arith.constant 0.000000e+00 : bf16
    %6 = vector.broadcast %cst : bf16 to vector<8x320xbf16>
    %c16 = arith.constant 16 : index
    %c0 = arith.constant 0 : index
    %7 = vector.load %arg7[%c16, %c0] : memref<24x320xbf16, #tpu.memory_space<vmem>>, vector<8x320xbf16>
    tpu.vector_store %arg7[%c16, %c0], %6 {strides = array<i32>} : memref<24x320xbf16, #tpu.memory_space<vmem>>, vector<8x320xbf16>,
    %cst_0 = arith.constant 0.000000e+00 : bf16
    %8 = vector.broadcast %cst_0 : bf16 to vector<8x384xbf16>
    %c16_1 = arith.constant 16 : index
    %c0_2 = arith.constant 0 : index
    %9 = vector.load %arg8[%c16_1, %c0_2] : memref<24x384xbf16, #tpu.memory_space<vmem>>, vector<8x384xbf16>
    tpu.vector_store %arg8[%c16_1, %c0_2], %8 {strides = array<i32>} : memref<24x384xbf16, #tpu.memory_space<vmem>>, vector<8x384xbf16>,
    %c0_3 = arith.constant 0 : index
    %c0_4 = arith.constant 0 : index
    %10 = vector.load %arg2[%c0_3, %c0_4] : memref<1x1280xf32, #tpu.memory_space<vmem>>, vector<1x320xf32>
    %c0_5 = arith.constant 0 : index
    %c0_6 = arith.constant 0 : index
    %11 = vector.load %arg0[%c0_5, %c0_6] : memref<24x21xbf16, #tpu.memory_space<vmem>>, vector<16x21xbf16>
    %c0_7 = arith.constant 0 : index
    %c0_8 = arith.constant 0 : index
    %c0_9 = arith.constant 0 : index
    %12 = vector.load %arg1[%c0_7, %c0_8, %c0_9] : memref<3x21x320xbf16, #tpu.memory_space<vmem>>, vector<1x21x320xbf16>
    %13 = vector.shape_cast %12 : vector<1x21x320xbf16> to vector<21x320xbf16>
    %cst_10 = arith.constant dense<0.000000e+00> : vector<16x320xf32>
    %14 = tpu.matmul %11, %13, %cst_10 {dimension_numbers = #tpu.dot_dimension_numbers<[1], [0], [0], [1], [0, 0, 1, 1], [], []>} : vector<16x21xbf16>, vector<21x320xbf16>, vector<16x320xf32> -> vector<16x320xf32>
    %c1 = arith.constant 1 : index
    %c0_11 = arith.constant 0 : index
    %15 = vector.load %arg0[%c1, %c0_11] : memref<24x21xbf16, #tpu.memory_space<vmem>>, vector<16x21xbf16>
    %c1_12 = arith.constant 1 : index
    %c0_13 = arith.constant 0 : index
    %c0_14 = arith.constant 0 : index
    %16 = vector.load %arg1[%c1_12, %c0_13, %c0_14] : memref<3x21x320xbf16, #tpu.memory_space<vmem>>, vector<1x21x320xbf16>
    %17 = vector.shape_cast %16 : vector<1x21x320xbf16> to vector<21x320xbf16>
    %cst_15 = arith.constant dense<0.000000e+00> : vector<16x320xf32>
    %18 = tpu.matmul %15, %17, %cst_15 {dimension_numbers = #tpu.dot_dimension_numbers<[1], [0], [0], [1], [0, 0, 1, 1], [], []>} : vector<16x21xbf16>, vector<21x320xbf16>, vector<16x320xf32> -> vector<16x320xf32>
    %19 = arith.addf %14, %18 : vector<16x320xf32>
    %c2 = arith.constant 2 : index
    %c0_16 = arith.constant 0 : index
    %20 = vector.load %arg0[%c2, %c0_16] : memref<24x21xbf16, #tpu.memory_space<vmem>>, vector<16x21xbf16>
    %c2_17 = arith.constant 2 : index
    %c0_18 = arith.constant 0 : index
    %c0_19 = arith.constant 0 : index
    %21 = vector.load %arg1[%c2_17, %c0_18, %c0_19] : memref<3x21x320xbf16, #tpu.memory_space<vmem>>, vector<1x21x320xbf16>
    %22 = vector.shape_cast %21 : vector<1x21x320xbf16> to vector<21x320xbf16>
    %cst_20 = arith.constant dense<0.000000e+00> : vector<16x320xf32>
    %23 = tpu.matmul %20, %22, %cst_20 {dimension_numbers = #tpu.dot_dimension_numbers<[1], [0], [0], [1], [0, 0, 1, 1], [], []>} : vector<16x21xbf16>, vector<21x320xbf16>, vector<16x320xf32> -> vector<16x320xf32>
    %24 = arith.addf %19, %23 : vector<16x320xf32>
    %25 = vector.broadcast %10 : vector<1x320xf32> to vector<16x320xf32>
    %26 = arith.addf %24, %25 : vector<16x320xf32>
    %cst_21 = arith.constant 0.000000e+00 : f32
    %27 = vector.broadcast %cst_21 : f32 to vector<16x320xf32>
    %28 = arith.maximumf %26, %27 : vector<16x320xf32>
    %29 = arith.truncf %28 : vector<16x320xf32> to vector<16x320xbf16>
    %c0_22 = arith.constant 0 : index
    %c0_23 = arith.constant 0 : index
    %30 = vector.load %arg7[%c0_22, %c0_23] : memref<24x320xbf16, #tpu.memory_space<vmem>>, vector<16x320xbf16>
    tpu.vector_store %arg7[%c0_22, %c0_23], %29 {strides = array<i32>} : memref<24x320xbf16, #tpu.memory_space<vmem>>, vector<16x320xbf16>,
    %c0_i32_24 = arith.constant 0 : i32
    %31 = tpu.memref_slice %arg12[%c0_i32_24] : memref<3x!tpu.dma_semaphore, #tpu.memory_space<semaphore_mem>> -> memref<1x!tpu.dma_semaphore, #tpu.memory_space<semaphore_mem>>
    %32 = tpu.memref_squeeze %31 : memref<1x!tpu.dma_semaphore, #tpu.memory_space<semaphore_mem>> -> memref<!tpu.dma_semaphore, #tpu.memory_space<semaphore_mem>>
    tpu.wait_dma2 semaphore(%32 : memref<!tpu.dma_semaphore, #tpu.memory_space<semaphore_mem>>) src(%arg3 : memref<3x320x384xbf16, #tpu.memory_space<any>>) dst(%arg9 : memref<3x320x384xbf16, #tpu.memory_space<vmem>>)
    %c0_25 = arith.constant 0 : index
    %c384 = arith.constant 384 : index
    %33 = vector.load %arg2[%c0_25, %c384] : memref<1x1280xf32, #tpu.memory_space<vmem>>, vector<1x384xf32>
    %c0_26 = arith.constant 0 : index
    %c0_27 = arith.constant 0 : index
    %34 = vector.load %arg7[%c0_26, %c0_27] : memref<24x320xbf16, #tpu.memory_space<vmem>>, vector<16x320xbf16>
    %c0_28 = arith.constant 0 : index
    %c0_29 = arith.constant 0 : index
    %c0_30 = arith.constant 0 : index
    %35 = vector.load %arg9[%c0_28, %c0_29, %c0_30] : memref<3x320x384xbf16, #tpu.memory_space<vmem>>, vector<1x320x384xbf16>
    %36 = vector.shape_cast %35 : vector<1x320x384xbf16> to vector<320x384xbf16>
    %cst_31 = arith.constant dense<0.000000e+00> : vector<16x384xf32>
    %37 = tpu.matmul %34, %36, %cst_31 {dimension_numbers = #tpu.dot_dimension_numbers<[1], [0], [0], [1], [0, 0, 1, 1], [], []>} : vector<16x320xbf16>, vector<320x384xbf16>, vector<16x384xf32> -> vector<16x384xf32>
    %c1_32 = arith.constant 1 : index
    %c0_33 = arith.constant 0 : index
    %38 = vector.load %arg7[%c1_32, %c0_33] : memref<24x320xbf16, #tpu.memory_space<vmem>>, vector<16x320xbf16>
    %c1_34 = arith.constant 1 : index
    %c0_35 = arith.constant 0 : index
    %c0_36 = arith.constant 0 : index
    %39 = vector.load %arg9[%c1_34, %c0_35, %c0_36] : memref<3x320x384xbf16, #tpu.memory_space<vmem>>, vector<1x320x384xbf16>
    %40 = vector.shape_cast %39 : vector<1x320x384xbf16> to vector<320x384xbf16>
    %cst_37 = arith.constant dense<0.000000e+00> : vector<16x384xf32>
    %41 = tpu.matmul %38, %40, %cst_37 {dimension_numbers = #tpu.dot_dimension_numbers<[1], [0], [0], [1], [0, 0, 1, 1], [], []>} : vector<16x320xbf16>, vector<320x384xbf16>, vector<16x384xf32> -> vector<16x384xf32>
    %42 = arith.addf %37, %41 : vector<16x384xf32>
    %c2_38 = arith.constant 2 : index
    %c0_39 = arith.constant 0 : index
    %43 = vector.load %arg7[%c2_38, %c0_39] : memref<24x320xbf16, #tpu.memory_space<vmem>>, vector<16x320xbf16>
    %c2_40 = arith.constant 2 : index
    %c0_41 = arith.constant 0 : index
    %c0_42 = arith.constant 0 : index
    %44 = vector.load %arg9[%c2_40, %c0_41, %c0_42] : memref<3x320x384xbf16, #tpu.memory_space<vmem>>, vector<1x320x384xbf16>
    %45 = vector.shape_cast %44 : vector<1x320x384xbf16> to vector<320x384xbf16>
    %cst_43 = arith.constant dense<0.000000e+00> : vector<16x384xf32>
    %46 = tpu.matmul %43, %45, %cst_43 {dimension_numbers = #tpu.dot_dimension_numbers<[1], [0], [0], [1], [0, 0, 1, 1], [], []>} : vector<16x320xbf16>, vector<320x384xbf16>, vector<16x384xf32> -> vector<16x384xf32>
    %47 = arith.addf %42, %46 : vector<16x384xf32>
    %48 = vector.broadcast %33 : vector<1x384xf32> to vector<16x384xf32>
    %49 = arith.addf %47, %48 : vector<16x384xf32>
    %cst_44 = arith.constant 0.000000e+00 : f32
    %50 = vector.broadcast %cst_44 : f32 to vector<16x384xf32>
    %51 = arith.maximumf %49, %50 : vector<16x384xf32>
    %52 = arith.truncf %51 : vector<16x384xf32> to vector<16x384xbf16>
    %c0_45 = arith.constant 0 : index
    %c0_46 = arith.constant 0 : index
    %53 = vector.load %arg8[%c0_45, %c0_46] : memref<24x384xbf16, #tpu.memory_space<vmem>>, vector<16x384xbf16>
    tpu.vector_store %arg8[%c0_45, %c0_46], %52 {strides = array<i32>} : memref<24x384xbf16, #tpu.memory_space<vmem>>, vector<16x384xbf16>,
    %c1_i32_47 = arith.constant 1 : i32
    %54 = tpu.memref_slice %arg12[%c1_i32_47] : memref<3x!tpu.dma_semaphore, #tpu.memory_space<semaphore_mem>> -> memref<1x!tpu.dma_semaphore, #tpu.memory_space<semaphore_mem>>
    %55 = tpu.memref_squeeze %54 : memref<1x!tpu.dma_semaphore, #tpu.memory_space<semaphore_mem>> -> memref<!tpu.dma_semaphore, #tpu.memory_space<semaphore_mem>>
    tpu.wait_dma2 semaphore(%55 : memref<!tpu.dma_semaphore, #tpu.memory_space<semaphore_mem>>) src(%arg4 : memref<3x384x256xbf16, #tpu.memory_space<any>>) dst(%arg10 : memref<3x384x256xbf16, #tpu.memory_space<vmem>>)
    %c0_48 = arith.constant 0 : index
    %c768 = arith.constant 768 : index
    %56 = vector.load %arg2[%c0_48, %c768] : memref<1x1280xf32, #tpu.memory_space<vmem>>, vector<1x256xf32>
    %c0_49 = arith.constant 0 : index
    %c0_50 = arith.constant 0 : index
    %57 = vector.load %arg8[%c0_49, %c0_50] : memref<24x384xbf16, #tpu.memory_space<vmem>>, vector<16x384xbf16>
    %c0_51 = arith.constant 0 : index
    %c0_52 = arith.constant 0 : index
    %c0_53 = arith.constant 0 : index
    %58 = vector.load %arg10[%c0_51, %c0_52, %c0_53] : memref<3x384x256xbf16, #tpu.memory_space<vmem>>, vector<1x384x256xbf16>
    %59 = vector.shape_cast %58 : vector<1x384x256xbf16> to vector<384x256xbf16>
    %cst_54 = arith.constant dense<0.000000e+00> : vector<16x256xf32>
    %60 = tpu.matmul %57, %59, %cst_54 {dimension_numbers = #tpu.dot_dimension_numbers<[1], [0], [0], [1], [0, 0, 1, 1], [], []>} : vector<16x384xbf16>, vector<384x256xbf16>, vector<16x256xf32> -> vector<16x256xf32>
    %c1_55 = arith.constant 1 : index
    %c0_56 = arith.constant 0 : index
    %61 = vector.load %arg8[%c1_55, %c0_56] : memref<24x384xbf16, #tpu.memory_space<vmem>>, vector<16x384xbf16>
    %c1_57 = arith.constant 1 : index
    %c0_58 = arith.constant 0 : index
    %c0_59 = arith.constant 0 : index
    %62 = vector.load %arg10[%c1_57, %c0_58, %c0_59] : memref<3x384x256xbf16, #tpu.memory_space<vmem>>, vector<1x384x256xbf16>
    %63 = vector.shape_cast %62 : vector<1x384x256xbf16> to vector<384x256xbf16>
    %cst_60 = arith.constant dense<0.000000e+00> : vector<16x256xf32>
    %64 = tpu.matmul %61, %63, %cst_60 {dimension_numbers = #tpu.dot_dimension_numbers<[1], [0], [0], [1], [0, 0, 1, 1], [], []>} : vector<16x384xbf16>, vector<384x256xbf16>, vector<16x256xf32> -> vector<16x256xf32>
    %65 = arith.addf %60, %64 : vector<16x256xf32>
    %c2_61 = arith.constant 2 : index
    %c0_62 = arith.constant 0 : index
    %66 = vector.load %arg8[%c2_61, %c0_62] : memref<24x384xbf16, #tpu.memory_space<vmem>>, vector<16x384xbf16>
    %c2_63 = arith.constant 2 : index
    %c0_64 = arith.constant 0 : index
    %c0_65 = arith.constant 0 : index
    %67 = vector.load %arg10[%c2_63, %c0_64, %c0_65] : memref<3x384x256xbf16, #tpu.memory_space<vmem>>, vector<1x384x256xbf16>
    %68 = vector.shape_cast %67 : vector<1x384x256xbf16> to vector<384x256xbf16>
    %cst_66 = arith.constant dense<0.000000e+00> : vector<16x256xf32>
    %69 = tpu.matmul %66, %68, %cst_66 {dimension_numbers = #tpu.dot_dimension_numbers<[1], [0], [0], [1], [0, 0, 1, 1], [], []>} : vector<16x384xbf16>, vector<384x256xbf16>, vector<16x256xf32> -> vector<16x256xf32>
    %70 = arith.addf %65, %69 : vector<16x256xf32>
    %71 = vector.broadcast %56 : vector<1x256xf32> to vector<16x256xf32>
    %72 = arith.addf %70, %71 : vector<16x256xf32>
    %cst_67 = arith.constant 0.000000e+00 : f32
    %73 = vector.broadcast %cst_67 : f32 to vector<16x256xf32>
    %74 = arith.maximumf %72, %73 : vector<16x256xf32>
    %c2_i32_68 = arith.constant 2 : i32
    %75 = tpu.memref_slice %arg12[%c2_i32_68] : memref<3x!tpu.dma_semaphore, #tpu.memory_space<semaphore_mem>> -> memref<1x!tpu.dma_semaphore, #tpu.memory_space<semaphore_mem>>
    %76 = tpu.memref_squeeze %75 : memref<1x!tpu.dma_semaphore, #tpu.memory_space<semaphore_mem>> -> memref<!tpu.dma_semaphore, #tpu.memory_space<semaphore_mem>>
    tpu.wait_dma2 semaphore(%76 : memref<!tpu.dma_semaphore, #tpu.memory_space<semaphore_mem>>) src(%arg5 : memref<384x128xbf16, #tpu.memory_space<any>>) dst(%arg11 : memref<384x128xbf16, #tpu.memory_space<vmem>>)
    %77 = arith.truncf %74 : vector<16x256xf32> to vector<16x256xbf16>
    %c0_69 = arith.constant 0 : index
    %c0_70 = arith.constant 0 : index
    %78 = vector.load %arg11[%c0_69, %c0_70] : memref<384x128xbf16, #tpu.memory_space<vmem>>, vector<256x128xbf16>
    %cst_71 = arith.constant dense<0.000000e+00> : vector<16x128xf32>
    %79 = tpu.matmul %77, %78, %cst_71 {dimension_numbers = #tpu.dot_dimension_numbers<[1], [0], [0], [1], [0, 0, 1, 1], [], []>} : vector<16x256xbf16>, vector<256x128xbf16>, vector<16x128xf32> -> vector<16x128xf32>
    %c0_72 = arith.constant 0 : index
    %c1024 = arith.constant 1024 : index
    %80 = vector.load %arg2[%c0_72, %c1024] : memref<1x1280xf32, #tpu.memory_space<vmem>>, vector<1x128xf32>
    %81 = vector.broadcast %80 : vector<1x128xf32> to vector<16x128xf32>
    %82 = arith.addf %79, %81 : vector<16x128xf32>
    %cst_73 = arith.constant 0.000000e+00 : f32
    %83 = vector.broadcast %cst_73 : f32 to vector<16x128xf32>
    %84 = arith.maximumf %82, %83 : vector<16x128xf32>
    %85 = arith.truncf %84 : vector<16x128xf32> to vector<16x128xbf16>
    %c256 = arith.constant 256 : index
    %c0_74 = arith.constant 0 : index
    %86 = vector.load %arg11[%c256, %c0_74] : memref<384x128xbf16, #tpu.memory_space<vmem>>, vector<128x128xbf16>
    %cst_75 = arith.constant dense<0.000000e+00> : vector<16x128xf32>
    %87 = tpu.matmul %85, %86, %cst_75 {dimension_numbers = #tpu.dot_dimension_numbers<[1], [0], [0], [1], [0, 0, 1, 1], [], []>} : vector<16x128xbf16>, vector<128x128xbf16>, vector<16x128xf32> -> vector<16x128xf32>
    %c0_76 = arith.constant 0 : index
    %c1152 = arith.constant 1152 : index
    %88 = vector.load %arg2[%c0_76, %c1152] : memref<1x1280xf32, #tpu.memory_space<vmem>>, vector<1x128xf32>
    %89 = vector.broadcast %88 : vector<1x128xf32> to vector<16x128xf32>
    %90 = arith.addf %87, %89 : vector<16x128xf32>
    %c0_77 = arith.constant 0 : index
    %c0_78 = arith.constant 0 : index
    %91 = vector.load %arg6[%c0_77, %c0_78] : memref<16x128xf32, #tpu.memory_space<vmem>>, vector<16x128xf32>
    tpu.vector_store %arg6[%c0_77, %c0_78], %90 {strides = array<i32>} : memref<16x128xf32, #tpu.memory_space<vmem>>, vector<16x128xf32>,
    return
  }
}

</mosaic_0001>

<bundles_post_ra>
// kernel: simplenet_forward.1
= control target key start
LH: loop header
LB: loop body
LE: loop exit
PB: predicated region body
PF: predicated region fallthrough
CT: control target
= control target key end

     0   :  { %s22_s21 = sld [smem:[#allocation0]]   ;;  %s2552_s22 = smov [#allocation4]   ;;  %v2553_v0 = vmov 0.0   ;;  %vm2555_vm0 = vmmov 0   ;;  %v2556_v1 = vmov 0   ;;  %vm171_vm1 = vcmask 1041408   ;;  %s2919_s0 = inlined_call_operand.vmem [shape: bf16[24,21], index: 0, kind: input, shape index: {}]   ;;  %s2920_s1 = inlined_call_operand.vmem [shape: bf16[3,21,320], index: 1, kind: input, shape index: {}]   ;;  %s2921_s2 = inlined_call_operand.vmem [shape: f32[1,1280], index: 2, kind: input, shape index: {}]   ;;  %s2922_s3 = inlined_call_operand.hbm [shape: bf16[3,320,384], index: 3, kind: input, shape index: {}]   ;;  %s2923_s4 = inlined_call_operand.hbm [shape: bf16[3,384,256], index: 4, kind: input, shape index: {}]   ;;  %s2924_s5 = inlined_call_operand.hbm [shape: bf16[384,128], index: 5, kind: input, shape index: {}]   ;;  %s2925_s6 = inlined_call_operand.vmem [shape: f32[16,128], index: 6, kind: output, shape index: {}]  }
   0x1   :  { %s2606_s23 = sshll.u32 %s2552_s22, 4  ;;  %2334 = vmatprep.subr.bf16.mxu1 %v2553_v0  ;;  %s2554_s24 = smov 384   ;;  %2338 = vmatprep.mubr.msk.bf16.mxu1 %vm2555_vm0, %v2553_v0  ;;  %vm172_vm2 = vcmask 1042432   ;;  %v2569_v2 = vmov 65535   ;;  %vm130_vm3 = vsmask.f32 7424  ;;  %s31_s23 = int_to_ptr.vmem [resolvable:$true] %s2606_s23 }
   0x2   :  { %34 = sst [smem:[#allocation9]] %s2554_s24  ;;  %216 = vmatprep.mubr.bf16.mxu0 %v2556_v1  ;;  %s2557_s25 = smov 3   ;;  %v173_v3 = vsel %vm171_vm1, 4294967295, %v2569_v2  ;;  %vm167_vm4 = vcmask 171008   ;;  %vm398_vm5 = vcmask 1046528   ;;  %vm101_vm6 = vcmask 519168  }
   0x3   :  { %36 = sst [smem:[#allocation9 + $0x1]] %s2554_s24  ;;  %s2558_s26 = smov 64   ;;  %v2629_v5 = vsel %vm172_vm2, %v173_v3, 0 }
   0x4   :  { %38 = sst [smem:[#allocation9 + $0x2]] %s2557_s25  ;;  %s2559_s28 = smov 128  }
   0x5   :  { %40 = sst [smem:[#allocation9 + $0x3]] %s2558_s26  ;;  %s2560_s30 = smov 2  }
   0x6   :  { %s2122_s27 = sshll.u32 %s22_s21, 26  ;;  %42 = sst [smem:[#allocation9 + $0x4]] %s2559_s28 }
   0x7   :  { %s2613_s29 = sadd.s32 134217728, %s2122_s27  ;;  %44 = sst [smem:[#allocation9 + $0x5]] %s2560_s30 }
   0x8   :  { %s2561_s7 = smov 192   ;;  %48 = sst [smem:[#allocation9 + $0x7]] %s2558_s26 }
   0x9   :  { %46 = sst [smem:[#allocation9 + $0x6]] %s2561_s7  ;;  %s2562_s8 = smov 4  }
   0xa   :  { %50 = sst [smem:[#allocation9 + $0x8]] %s2562_s8  ;;  %s2563_s9 = smov [#allocation7]  }
   0xb   :  { %s2564_s10 = smov [#allocation8]   ;;  %s2565_s13 = smov 256  }
   0xc   :  { %52 = dma.general %s2922_s3, 23040, %s31_s23, %s2563_s9, %s2564_s10, [#allocation9], %s2613_s29, 0  }
   0xd   :  { %73 = sst [smem:[#allocation11 + $0x2]] %s2560_s30  ;;  %s2566_s14 = smov [#allocation5]  }
   0xe   :  { %69 = sst [smem:[#allocation11]] %s2565_s13  ;;  %s65_s15 = sshll.u32 %s2566_s14, 4  ;;  %s66_s15 = int_to_ptr.vmem [resolvable:$true] %s65_s15 }
   0xf   :  { %71 = sst [smem:[#allocation11 + $0x1]] %s2565_s13  ;;  %s2567_s16 = smov [#allocation7 + $0x1]  }
  0x10   :  { %75 = sst [smem:[#allocation11 + $0x3]] %s2558_s26  ;;  %s2568_s17 = smov [#allocation10]  }
  0x11   :  { %77 = sst [smem:[#allocation11 + $0x4]] %s2559_s28 }
  0x12   :  { %79 = sst [smem:[#allocation11 + $0x5]] %s2560_s30 }
  0x13   :  { %81 = sst [smem:[#allocation11 + $0x6]] %s2559_s28 }
  0x14   :  { %83 = sst [smem:[#allocation11 + $0x7]] %s2558_s26 }
  0x15   :  { %85 = sst [smem:[#allocation11 + $0x8]] %s2562_s8  ;;  %s2524_s8 = scalar_lea.hbm %s2924_s5, 3072 }
  0x16   :  { %87 = dma.general %s2923_s4, 18432, %s66_s15, %s2567_s16, %s2568_s17, [#allocation11], %s2613_s29, 0  }
  0x17   :  { %100 = vst [vmem:[#allocation2 + $0x18] sm:$0xff] %v2556_v1  ;;  %103 = vst [vmem:[#allocation3 + $0x18] sm:$0xff] %v2556_v1  ;;  %v2481_v4 = vld [vmem:[%s2920_s1 + $0x28] ss:$12 sps:$4 sm:$0xff]   ;;  %v2483_v6 = vld [vmem:[%s2920_s1 + $0x2c] ss:$12 sps:$4 sm:$0xff]   ;;  %p2525_p0 = scmp.ne.s32.totalorder %s2924_s5, %s2524_s8  ;;  %p2528_p1 = scmp.lt.u32.totalorder %s2524_s8, %s2924_s5 }
  0x18   :  { %104 = vst [vmem:[#allocation3 + $0x20] sm:$0xf] %v2556_v1  ;;  %184 = vmatprep.subr.bf16.mxu0 %v2481_v4  ;;  %v2484_v7 = vld [vmem:[%s2920_s1 + $0x24] ss:$12 sps:$4 sm:$0xff]   ;;  %v2130_v8 = vld [vmem:[%s2920_s1 + $0x3c] sm:$0x77]  ;;  %2335 = vmatpush3.bf16.msra.mxu1 %v2483_v6 }
  0x19   :  { %v2138_v9 = vcombine.high %v2130_v8, %v2130_v8  ;;  %v2486_v10 = vld [vmem:[%s2920_s1 + $0x44] ss:$0 sps:$4 sm:$0x77]   ;;  %v2137_v11 = vcombine.low %v2130_v8, %v2130_v8  ;;  %v106_v12 = vld [vmem:[%s2919_s0] sm:$0xf]  ;;  %185 = vmatpush1.bf16.msra.mxu0 %v2484_v7  ;;  %2336 = vmatprep.subr.bf16.mxu1 %v2553_v0  ;;  %p2530_p2 = pnand %p2528_p1, %p2525_p0 }
  0x1a   :  { %v107_v13 = vld [vmem:[%s2919_s0 + $0x4] sm:$0xf]  ;;  %v182_v15 = vand.u32 %v2486_v10, %v2629_v5  ;;  %v2489_v18 = vld [vmem:[%s2919_s0 + $0x8] ss:$0 sps:$4 sm:$0x11]  }
  0x1b   :  { %v179_v14 = vand.u32 %v2138_v9, %v2629_v5  ;;  %v176_v16 = vand.u32 %v2137_v11, %v2629_v5  ;;  %v2132_v17 = vcombine.low %v106_v12, %v107_v13  ;;  %v2492_v19 = vld [vmem:[%s2920_s1 + $0x4] ss:$12 sps:$4 sm:$0xff]   ;;  %v139_v22 = vshll.u32 %v2489_v18, 16  ;;  %v112_v25 = vld [vmem:[%s2920_s1 + $0x18] sm:$0x77] }
  0x1c   :  { %2337 = vmatpush3.bf16.msra.mxu1 %v182_v15  ;;  %v2490_v26 = vld [vmem:[%s2920_s1] ss:$12 sps:$4 sm:$0xff]   ;;  %v2493_v27 = vld [vmem:[%s2920_s1 + $0x8] ss:$12 sps:$4 sm:$0xff]   ;;  %v2146_v28 = vcombine.high %v112_v25, %v112_v25  ;;  %v2145_v31 = vcombine.low %v112_v25, %v112_v25  ;;  %v2497_v39 = vld [vmem:[%s2920_s1 + $0x50] ss:$12 sps:$4 sm:$0xff]  }
  0x1d   :  { %186 = vmatprep.subr.bf16.mxu0 %v179_v14  ;;  %v132_v20 = vshrl.u32 %v2132_v17, 16  ;;  %v134_v21 = vshll.u32 %v2132_v17, 16  ;;  %2342 = vmatprep.subr.bf16.mxu1 %v2553_v0  ;;  %v141_v24 = vrot.slane %v139_v22, 1  ;;  %v2494_v30 = vld [vmem:[%s2920_s1 + $0x20] ss:$0 sps:$4 sm:$0x77]  }
  0x1e   :  { %187 = vmatpush1.bf16.msra.mxu0 %v176_v16  ;;  %v298_v32 = vand.u32 %v2146_v28, %v2629_v5  ;;  %v301_v34 = vand.u32 %v2494_v30, %v2629_v5  ;;  %v295_v35 = vand.u32 %v2145_v31, %v2629_v5  ;;  %v2500_v36 = vld [vmem:[%s2920_s1 + $0x4c] ss:$12 sps:$4 sm:$0xff]   ;;  %v387_v37 = vld [vmem:[%s2919_s0] sm:$0xe]  ;;  %v2498_v43 = vld [vmem:[%s2920_s1 + $0x48] ss:$12 sps:$4 sm:$0xff]  }
  0x1f   :  { %v136_v23 = vrot.slane %v134_v21, 1  ;;  %303 = vmatprep.subr.bf16.mxu0 %v2492_v19  ;;  %v2154_v38 = vld [vmem:[%s2920_s1 + $0x60] sm:$0x77]  ;;  %v2501_v40 = vld [vmem:[%s2920_s1 + $0x68] ss:$0 sps:$4 sm:$0x77]   ;;  %v2156_v41 = vcombine.low %v387_v37, %v107_v13 }
  0x20   :  { %v2161_v42 = vcombine.high %v2154_v38, %v2154_v38  ;;  %v436_v44 = vand.u32 %v2501_v40, %v2629_v5  ;;  %v400_v46 = vrot.slane %v2489_v18, 1  ;;  %v2160_v47 = vcombine.low %v2154_v38, %v2154_v38  ;;  %102 = vst.msk [vmem:[#allocation2 + $0x20] sm:$0xf] %vm101_vm6, %v2556_v1  ;;  %s2570_s1 = smov [#allocation6]  }
  0x21   :  { %v137_v29 = vor.u32 %v136_v23, %v132_v20  ;;  %v399_v45 = vrot.slane %v2156_v41, 1  ;;  %s96_s29 = sshll.u32 %s2570_s1, 4  ;;  %s97_s29 = int_to_ptr.vmem [resolvable:$true] %s96_s29 }
  0x22   :  { %v433_v48 = vand.u32 %v2161_v42, %v2629_v5  ;;  %v430_v50 = vand.u32 %v2160_v47, %v2629_v5 }
  0x23   :  { %v142_v33 = vsel %vm130_vm3, %v137_v29, %v141_v24  ;;  %v401_v49 = vsel %vm398_vm5, %v399_v45, %v400_v46 }
  0x24   :  { %2339 = vmatmul.mubr.msk.bf16.vlgmr.msra.gmra.mrb[0].mxu1 %vm167_vm4, %v142_v33  ;;  %2140 = vmatmul.mubr.msk.bf16.vlgmr.msra.gmra.mrb[0].mxu0 %vm167_vm4, %v142_v33 }
  0x25   :  { %2343 = vmatpush3.bf16.msra.mxu1 %v2493_v27  ;;  %304 = vmatpush1.bf16.msra.mxu0 %v2490_v26 }
  0x26   :  { %2344 = vmatprep.subr.bf16.mxu1 %v2553_v0  ;;  %305 = vmatprep.subr.bf16.mxu0 %v298_v32 }
  0x27   :  { %2346 = vmatprep.mubr.msk.bf16.mxu1 %vm2555_vm0, %v2553_v0  ;;  %335 = vmatprep.mubr.bf16.mxu0 %v2556_v1 }
  0x29   :  { %2345 = vmatpush3.bf16.msra.mxu1 %v301_v34  ;;  %306 = vmatpush1.bf16.msra.mxu0 %v295_v35 }
  0x2a   :  { %2350 = vmatprep.subr.bf16.mxu1 %v2553_v0  ;;  %438 = vmatprep.subr.bf16.mxu0 %v2500_v36 }
  0x2c   :  { %2347 = vmatmul.mubr.msk.bf16.vlgmr.msra.gmra.mrb[4].mxu1 %vm167_vm4, %v2132_v17 }
  0x2d   :  { %2351 = vmatpush3.bf16.msra.mxu1 %v2497_v39  ;;  %2354 = vmatprep.mubr.msk.bf16.mxu1 %vm2555_vm0, %v2553_v0 }
  0x2e   :  { %2352 = vmatprep.subr.bf16.mxu1 %v2553_v0 }
  0x30   :  { %2148 = vmatmul.mubr.msk.bf16.vlgmr.msra.gmra.mrb[0].mxu0 %vm167_vm4, %v2132_v17 }
  0x31   :  { %2353 = vmatpush3.bf16.msra.mxu1 %v436_v44  ;;  %439 = vmatpush1.bf16.msra.mxu0 %v2498_v43 }
  0x32   :  { %440 = vmatprep.subr.bf16.mxu0 %v433_v48  ;;  %470 = vmatprep.mubr.bf16.mxu0 %v2556_v1 }
  0x34   :  { %2355 = vmatmul.mubr.msk.bf16.vlgmr.msra.gmra.mrb[8].mxu1 %vm167_vm4, %v401_v49 }
  0x35   :  { %441 = vmatpush1.bf16.msra.mxu0 %v430_v50 }
  0x3c   :  { %2163 = vmatmul.mubr.msk.bf16.vlgmr.msra.gmra.mrb[0].mxu0 %vm167_vm4, %v401_v49 }
  0x3d   :  { %2533 = shalt.err (!%p2530_p2)  }
  0x3e   :  { %s2534_s13 = scalar_lea.vmem %s97_s29, 3072  ;;  %p2539_p4 = scmp.lt.s32.totalorder %s97_s29, %s97_s29 }
  0x3f   :  { %p2535_p3 = scmp.ne.s32.totalorder %s97_s29, %s2534_s13  ;;  %p2540_p5 = scmp.lt.s32.totalorder %s2534_s13, %s2534_s13 }
  0x41   :  { %p2541_p6 = por %p2540_p5, %p2539_p4 }
  0x43   :  { %p2542_p7 = pnand %p2541_p6, %p2535_p3 }
  0x45   :  { %2545 = shalt.err (!%p2542_p7)  }
  0x46   :  { %99 = dma.hbm_to_vmem [thread:$0]  %s2924_s5, 3072, %s97_s29, [#allocation7 + $0x2]  ;;  %v529_v55 = vlaneseq  ;;  %v105_v2 = vld [vmem:[%s2921_s2] sm:$0x7] }
  0x48   :  { %v2727_v56 = vshrl.u32 %v529_v55, 7 }
  0x4a   :  { %v539_v63 = vsub.s32 2, %v2727_v56  ;;  %v2736_v7 = vsub.s32 0, %v2727_v56  ;;  %v2739_v9 = vsub.s32 1, %v2727_v56 }
  0x4c   :  { %v540_v3 = vrot.slane %v105_v2, %v539_v63  ;;  %v532_v15 = vrot.slane %v105_v2, %v2736_v7  ;;  %v536_v16 = vrot.slane %v105_v2, %v2739_v9 }
  0xf7   :  { %v261_v51 = vpop.f32.mrb[0].mxu1 }
  0xf8   :  { %v2340_v52 = vpop.f32.mrb[1].mxu1 }
  0xf9   :  { %v264_v53 = vpop.f32.mrb[2].mxu1 }
  0xfa   :  { %v2341_v54 = vpop.f32.mrb[3].mxu1 }
  0xff   :  { %v380_v57 = vpop.f32.mrb[4].mxu1 }
 0x100   :  { %v381_v58 = vadd.f32 %v380_v57, %v261_v51  ;;  %v2348_v59 = vpop.f32.mrb[5].mxu1 }
 0x101   :  { %v383_v60 = vpop.f32.mrb[6].mxu1 }
 0x102   :  { %v384_v61 = vadd.f32 %v383_v60, %v264_v53  ;;  %v2349_v62 = vpop.f32.mrb[7].mxu1 }
 0x107   :  { %v515_v4 = vpop.f32.mrb[8].mxu1 }
 0x108   :  { %v524_v5 = vadd.f32 %v515_v4, %v381_v58  ;;  %v2356_v6 = vpop.f32.mrb[9].mxu1 }
 0x109   :  { %v518_v8 = vpop.f32.mrb[10].mxu1 }
 0x10a   :  { %v546_v10 = vadd.f32 %v540_v3, %v524_v5  ;;  %v527_v11 = vadd.f32 %v518_v8, %v384_v61  ;;  %v2357_v12 = vpop.f32.mrb[11].mxu1 }
 0x10c   :  { %v552_v13 = vmax.f32 %v546_v10, 0.0  ;;  %v549_v14 = vadd.f32 %v540_v3, %v527_v11 }
 0x10e   :  { %v2206_v17 = vpack.c.bf16 %v552_v13, %v552_v13  ;;  %v555_v18 = vmax.f32 %v549_v14, 0.0 }
 0x10f   :  { %v472_v19 = vpop.f32.mrb[0].mxu0 }
 0x110   :  { %577 = vst.msk [vmem:[#allocation2 + $0x8] sm:$0xf] %vm101_vm6, %v2206_v17  ;;  %v2208_v20 = vpack.c.bf16 %v555_v18, %v555_v18  ;;  %v544_v21 = vadd.f32 %v532_v15, %v472_v19  ;;  %v474_v22 = vpop.f32.mrb[1].mxu0 }
 0x111   :  { %v545_v23 = vadd.f32 %v536_v16, %v474_v22  ;;  %v476_v24 = vpop.f32.mrb[2].mxu0 }
 0x112   :  { %579 = vst.msk [vmem:[#allocation2 + $0x14] sm:$0xf] %vm101_vm6, %v2208_v20  ;;  %v550_v25 = vmax.f32 %v544_v21, 0.0  ;;  %v547_v26 = vadd.f32 %v532_v15, %v476_v24  ;;  %v478_v27 = vpop.f32.mrb[3].mxu0 }
 0x113   :  { %v551_v28 = vmax.f32 %v545_v23, 0.0  ;;  %v548_v29 = vadd.f32 %v536_v16, %v478_v27 }
 0x114   :  { %v553_v30 = vmax.f32 %v547_v26, 0.0 }
 0x115   :  { %v2205_v31 = vpack.c.bf16 %v551_v28, %v550_v25  ;;  %v554_v32 = vmax.f32 %v548_v29, 0.0 }
 0x117   :  { %576 = vst [vmem:[#allocation2] sm:$0xff] %v2205_v31  ;;  %v2207_v33 = vpack.c.bf16 %v554_v32, %v553_v30 }
 0x119   :  { %578 = vst [vmem:[#allocation2 + $0xc] sm:$0xff] %v2207_v33 }
 0x11a   :  { %2546 = dma.done.wait [#allocation7], 23040 }
 0x11b   :  { %2547 = vsyncadd [#allocation7], 4294944256  ;;  %v654_v34 = vld [vmem:[#allocation4 + $0x1e8] sm:$0xff]  ;;  %v679_v35 = vld [vmem:[#allocation4 + $0x2b0] sm:$0xff]  ;;  %vm772_vm7 = vcmask 523264  }
 0x11c   :  { %v653_v36 = vld [vmem:[#allocation4 + $0x1e0] sm:$0xff]  ;;  %776 = vmatprep.subr.bf16.mxu0 %v654_v34  ;;  %2222 = vmatprep.subr.bf16.mxu1 %v679_v35  ;;  %v655_v37 = vld [vmem:[#allocation4 + $0x1f0] sm:$0xff]  ;;  %v682_v39 = vld [vmem:[#allocation4 + $0x2c8] sm:$0xff] }
 0x11d   :  { %v657_v38 = vld [vmem:[#allocation4 + $0x200] sm:$0xff]  ;;  %777 = vmatpush1.bf16.msra.mxu0 %v653_v36  ;;  %2223 = vmatpush3.bf16.msra.mxu1 %v655_v37  ;;  %v656_v40 = vld [vmem:[#allocation4 + $0x1f8] sm:$0xff]  ;;  %v658_v41 = vld [vmem:[#allocation4 + $0x208] sm:$0xff] }
 0x11e   :  { %778 = vmatprep.subr.bf16.mxu0 %v657_v38  ;;  %2224 = vmatprep.subr.bf16.mxu1 %v682_v39  ;;  %v660_v42 = vld [vmem:[#allocation4 + $0x218] sm:$0xff]  ;;  %v685_v43 = vld [vmem:[#allocation4 + $0x2e0] sm:$0xff]  ;;  %v659_v44 = vld [vmem:[#allocation4 + $0x210] sm:$0xff] }
 0x11f   :  { %v661_v45 = vld [vmem:[#allocation4 + $0x220] sm:$0xff]  ;;  %v663_v46 = vld [vmem:[#allocation4 + $0x230] sm:$0xff]  ;;  %v688_v47 = vld [vmem:[#allocation4 + $0x2f8] sm:$0xff] }
 0x120   :  { %v662_v48 = vld [vmem:[#allocation4 + $0x228] sm:$0xff]  ;;  %v664_v49 = vld [vmem:[#allocation4 + $0x238] sm:$0xff]  ;;  %v650_v52 = vld [vmem:[#allocation2 + $0x18] sm:$0x11] }
 0x121   :  { %779 = vmatpush1.bf16.msra.mxu0 %v656_v40  ;;  %2225 = vmatpush3.bf16.msra.mxu1 %v658_v41  ;;  %v586_v50 = vld [vmem:[#allocation2] sm:$0xff]  ;;  %v2745_v51 = vld [vmem:[#allocation2 + $0xc] sm:$0xff]  ;;  %v691_v54 = vld [vmem:[#allocation4 + $0x310] sm:$0xff]  ;;  %v2750_v57 = vcombine.high %v650_v52, %v650_v52  ;;  %v2758_v10 = vcombine.low %v650_v52, %v650_v52 }
 0x122   :  { %780 = vmatprep.subr.bf16.mxu0 %v660_v42  ;;  %2226 = vmatprep.subr.bf16.mxu1 %v685_v43  ;;  %v666_v53 = vld [vmem:[#allocation4 + $0x248] sm:$0xff]  ;;  %v2748_v55 = vcombine.high %v586_v50, %v2745_v51  ;;  %v2756_v61 = vcombine.low %v586_v50, %v2745_v51  ;;  %v665_v62 = vld [vmem:[#allocation4 + $0x240] sm:$0xff]  ;;  %v667_v2 = vld [vmem:[#allocation4 + $0x250] sm:$0xff] }
 0x123   :  { %v754_v60 = vshll.u32 %v2750_v57, 16  ;;  %v669_v3 = vld [vmem:[#allocation4 + $0x260] sm:$0xff]  ;;  %v694_v4 = vld [vmem:[#allocation4 + $0x328] sm:$0xff]  ;;  %v668_v12 = vld [vmem:[#allocation4 + $0x258] sm:$0xff]  ;;  %v742_v19 = vshll.u32 %v2758_v10, 16 }
 0x124   :  { %v747_v58 = vshrl.u32 %v2748_v55, 16  ;;  %v749_v59 = vshll.u32 %v2748_v55, 16  ;;  %v737_v11 = vshll.u32 %v2756_v61, 16  ;;  %v670_v13 = vld [vmem:[#allocation4 + $0x268] sm:$0xff]  ;;  %v672_v14 = vld [vmem:[#allocation4 + $0x278] sm:$0xff]  ;;  %v697_v15 = vld [vmem:[#allocation4 + $0x340] sm:$0xff] }
 0x125   :  { %781 = vmatpush1.bf16.msra.mxu0 %v659_v44  ;;  %2227 = vmatpush3.bf16.msra.mxu1 %v661_v45  ;;  %v756_v6 = vrot.slane %v754_v60, 1  ;;  %v735_v17 = vshrl.u32 %v2756_v61, 16  ;;  %v671_v20 = vld [vmem:[#allocation4 + $0x270] sm:$0xff]  ;;  %v673_v21 = vld [vmem:[#allocation4 + $0x280] sm:$0xff]  ;;  %v700_v23 = vld [vmem:[#allocation4 + $0x358] sm:$0xff]  ;;  %v744_v26 = vrot.slane %v742_v19, 1 }
 0x126   :  { %782 = vmatprep.subr.bf16.mxu0 %v663_v46  ;;  %2228 = vmatprep.subr.bf16.mxu1 %v688_v47  ;;  %v751_v5 = vrot.slane %v749_v59, 1  ;;  %v739_v18 = vrot.slane %v737_v11, 1  ;;  %v675_v22 = vld [vmem:[#allocation4 + $0x290] sm:$0xff]  ;;  %v674_v24 = vld [vmem:[#allocation4 + $0x288] sm:$0xff]  ;;  %v676_v27 = vld [vmem:[#allocation4 + $0x298] sm:$0xff]  ;;  %v1191_v59 = vrot.slane %v2750_v57, 1 }
 0x127   :  { %v587_v28 = vld [vmem:[#allocation2 + $0x8] sm:$0xf]  ;;  %v2764_v29 = vld [vmem:[#allocation2 + $0x14] sm:$0xf]  ;;  %v703_v34 = vld [vmem:[#allocation4 + $0x370] sm:$0xff] }
 0x128   :  { %v752_v8 = vor.u32 %v751_v5, %v747_v58  ;;  %v740_v25 = vor.u32 %v739_v18, %v735_v17  ;;  %v678_v30 = vld [vmem:[#allocation4 + $0x2a8] sm:$0xff]  ;;  %v2770_v32 = vcombine.low %v587_v28, %v2764_v29  ;;  %v677_v33 = vld [vmem:[#allocation4 + $0x2a0] sm:$0xff]  ;;  %v2774_v36 = vld [vmem:[#allocation2 + $0x20] ss:$0 sps:$4 sm:$0x11]  }
 0x129   :  { %783 = vmatpush1.bf16.msra.mxu0 %v662_v48  ;;  %2229 = vmatpush3.bf16.msra.mxu1 %v664_v49  ;;  %v681_v35 = vld [vmem:[#allocation4 + $0x2c0] sm:$0xff]  ;;  %v680_v38 = vld [vmem:[#allocation4 + $0x2b8] sm:$0xff]  ;;  %v706_v39 = vld [vmem:[#allocation4 + $0x388] sm:$0xff]  ;;  %v766_v43 = vshll.u32 %v2774_v36, 16 }
 0x12a   :  { %784 = vmatprep.subr.bf16.mxu0 %v666_v53  ;;  %2230 = vmatprep.subr.bf16.mxu1 %v691_v54  ;;  %v757_v16 = vsel %vm130_vm3, %v752_v8, %v756_v6  ;;  %v2767_v31 = vsel %vm130_vm3, %v740_v25, %v744_v26  ;;  %v761_v37 = vshll.u32 %v2770_v32, 16  ;;  %v684_v40 = vld [vmem:[#allocation4 + $0x2d8] sm:$0xff]  ;;  %v759_v41 = vshrl.u32 %v2770_v32, 16  ;;  %v683_v44 = vld [vmem:[#allocation4 + $0x2d0] sm:$0xff]  ;;  %v709_v45 = vld [vmem:[#allocation4 + $0x3a0] sm:$0xff] }
 0x12b   :  { %894 = vmatprep.mubr.bf16.mxu1 %v757_v16  ;;  %808 = vmatprep.mubr.bf16.mxu0 %v757_v16  ;;  %v687_v46 = vld [vmem:[#allocation4 + $0x2f0] sm:$0xff]  ;;  %v768_v48 = vrot.slane %v766_v43, 1  ;;  %v686_v49 = vld [vmem:[#allocation4 + $0x2e8] sm:$0xff]  ;;  %v712_v50 = vld [vmem:[#allocation4 + $0x3b8] sm:$0xff] }
 0x12c   :  { %v763_v42 = vrot.slane %v761_v37, 1  ;;  %v1116_v52 = vld [vmem:[#allocation2] sm:$0xee]  ;;  %v690_v53 = vld [vmem:[#allocation4 + $0x308] sm:$0xff]  ;;  %v616_v54 = vld [vmem:[#allocation4 + $0xd0] sm:$0xff] }
 0x12d   :  { %785 = vmatpush1.bf16.msra.mxu0 %v665_v62  ;;  %2231 = vmatpush3.bf16.msra.mxu1 %v667_v2  ;;  %v2180_v58 = vcombine.high %v1116_v52, %v2745_v51  ;;  %v2179_v60 = vcombine.low %v1116_v52, %v2745_v51  ;;  %v1188_v62 = vrot.slane %v2758_v10, 1  ;;  %v689_v5 = vld [vmem:[#allocation4 + $0x300] sm:$0xff]  ;;  %v592_v6 = vld [vmem:[#allocation4 + $0x10] sm:$0xff]  ;;  %v595_v16 = vld [vmem:[#allocation4 + $0x28] sm:$0xff] }
 0x12e   :  { %786 = vmatprep.subr.bf16.mxu0 %v669_v3  ;;  %2232 = vmatprep.subr.bf16.mxu1 %v694_v4  ;;  %v764_v47 = vor.u32 %v763_v42, %v759_v41  ;;  %v1117_v8 = vld [vmem:[#allocation2 + $0x8] sm:$0xe]  ;;  %v696_v17 = vld [vmem:[#allocation4 + $0x338] sm:$0xff]  ;;  %v702_v26 = vld [vmem:[#allocation4 + $0x368] sm:$0xff] }
 0x12f   :  { %v1190_v3 = vrot.slane %v2180_v58, 1  ;;  %v1187_v4 = vrot.slane %v2179_v60, 1  ;;  %v693_v11 = vld [vmem:[#allocation4 + $0x320] sm:$0xff]  ;;  %v2181_v10 = vcombine.low %v1117_v8, %v2764_v29  ;;  %v601_v25 = vld [vmem:[#allocation4 + $0x58] sm:$0xff]  ;;  %v604_v29 = vld [vmem:[#allocation4 + $0x70] sm:$0xff] }
 0x130   :  { %v2789_v2 = vsel %vm130_vm3, %v764_v47, %v768_v48  ;;  %v622_v18 = vld [vmem:[#allocation4 + $0x100] sm:$0xff]  ;;  %v637_v41 = vld [vmem:[#allocation4 + $0x178] sm:$0xff]  ;;  %v591_v43 = vld [vmem:[#allocation4 + $0x8] sm:$0xff] }
 0x131   :  { %787 = vmatpush1.bf16.msra.mxu0 %v668_v12  ;;  %2233 = vmatpush3.bf16.msra.mxu1 %v670_v13  ;;  %v619_v12 = vld [vmem:[#allocation4 + $0xe8] sm:$0xff]  ;;  %v2792_v57 = vsel %vm398_vm5, %v1190_v3, %v1191_v59  ;;  %v2795_v51 = vsel %vm398_vm5, %v1187_v4, %v1188_v62  ;;  %v1194_v13 = vrot.slane %v2774_v36, 1  ;;  %v701_v28 = vld [vmem:[#allocation4 + $0x360] sm:$0xff]  ;;  %v708_v36 = vld [vmem:[#allocation4 + $0x398] sm:$0xff] }
 0x132   :  { %788 = vmatprep.subr.bf16.mxu0 %v672_v14  ;;  %2234 = vmatprep.subr.bf16.mxu1 %v697_v15  ;;  %v1193_v14 = vrot.slane %v2181_v10, 1  ;;  %v692_v15 = vld [vmem:[#allocation4 + $0x318] sm:$0xff]  ;;  %v634_v37 = vld [vmem:[#allocation4 + $0x160] sm:$0xff]  ;;  %v643_v48 = vld [vmem:[#allocation4 + $0x1a8] sm:$0xff] }
 0x133   :  { %v613_v42 = vld [vmem:[#allocation4 + $0xb8] sm:$0xff]  ;;  %v646_v52 = vld [vmem:[#allocation4 + $0x1c0] sm:$0xff]  ;;  %v603_v59 = vld [vmem:[#allocation4 + $0x68] sm:$0xff] }
 0x134   :  { %v2803_v19 = vsel %vm398_vm5, %v1193_v14, %v1194_v13  ;;  %v593_v47 = vld [vmem:[#allocation4 + $0x18] sm:$0xff]  ;;  %v1145_v60 = vld [vmem:[#allocation4 + $0x490] sm:$0xff]  ;;  %v1148_v3 = vld [vmem:[#allocation4 + $0x4a8] sm:$0xff] }
 0x135   :  { %789 = vmatpush1.bf16.msra.mxu0 %v671_v20  ;;  %2235 = vmatpush3.bf16.msra.mxu1 %v673_v21  ;;  %v695_v20 = vld [vmem:[#allocation4 + $0x330] sm:$0xff]  ;;  %v598_v21 = vld [vmem:[#allocation4 + $0x40] sm:$0xff]  ;;  %v649_v58 = vld [vmem:[#allocation4 + $0x1d8] sm:$0xff] }
 0x136   :  { %790 = vmatprep.subr.bf16.mxu0 %v675_v22  ;;  %2236 = vmatprep.subr.bf16.mxu1 %v700_v23  ;;  %v699_v22 = vld [vmem:[#allocation4 + $0x350] sm:$0xff]  ;;  %v625_v23 = vld [vmem:[#allocation4 + $0x118] sm:$0xff]  ;;  %v1151_v8 = vld [vmem:[#allocation4 + $0x4c0] sm:$0xff] }
 0x137   :  { %v1121_v62 = vld [vmem:[#allocation4 + $0x3d0] sm:$0xff]  ;;  %v605_v4 = vld [vmem:[#allocation4 + $0x78] sm:$0xff]  ;;  %v611_v14 = vld [vmem:[#allocation4 + $0xa8] sm:$0xff] }
 0x138   :  { %v612_v10 = vld [vmem:[#allocation4 + $0xb0] sm:$0xff]  ;;  %v1154_v13 = vld [vmem:[#allocation4 + $0x4d8] sm:$0xff] }
 0x139   :  { %791 = vmatpush1.bf16.msra.mxu0 %v674_v24  ;;  %2237 = vmatpush3.bf16.msra.mxu1 %v676_v27  ;;  %v698_v24 = vld [vmem:[#allocation4 + $0x348] sm:$0xff]  ;;  %v628_v27 = vld [vmem:[#allocation4 + $0x130] sm:$0xff] }
 0x13a   :  { %792 = vmatprep.subr.bf16.mxu0 %v678_v30  ;;  %2358 = vmatprep.subr.bf16.mxu1 %v2553_v0  ;;  %v705_v30 = vld [vmem:[#allocation4 + $0x380] sm:$0xff] }
 0x13c   :  { %895 = vmatmul.mubr.bf16.vlgmr.msra.gmra.mrb[12].mxu1 %v2767_v31 }
 0x13d   :  { %793 = vmatpush1.bf16.msra.mxu0 %v677_v33  ;;  %2359 = vmatpush3.bf16.msra.mxu1 %v703_v34  ;;  %v631_v33 = vld [vmem:[#allocation4 + $0x148] sm:$0xff]  ;;  %v704_v34 = vld [vmem:[#allocation4 + $0x378] sm:$0xff] }
 0x13e   :  { %794 = vmatprep.subr.bf16.mxu0 %v681_v35  ;;  %2360 = vmatprep.subr.bf16.mxu1 %v2553_v0  ;;  %v607_v35 = vld [vmem:[#allocation4 + $0x88] sm:$0xff] }
 0x13f   :  { %2366 = vmatprep.mubr.msk.bf16.mxu1 %vm2555_vm0, %v2553_v0 }
 0x141   :  { %795 = vmatpush1.bf16.msra.mxu0 %v680_v38  ;;  %2361 = vmatpush3.bf16.msra.mxu1 %v706_v39  ;;  %v707_v38 = vld [vmem:[#allocation4 + $0x390] sm:$0xff]  ;;  %v610_v39 = vld [vmem:[#allocation4 + $0xa0] sm:$0xff] }
 0x142   :  { %796 = vmatprep.subr.bf16.mxu0 %v684_v40  ;;  %2362 = vmatprep.subr.bf16.mxu1 %v2553_v0  ;;  %v711_v40 = vld [vmem:[#allocation4 + $0x3b0] sm:$0xff] }
 0x145   :  { %797 = vmatpush1.bf16.msra.mxu0 %v683_v44  ;;  %2363 = vmatpush3.bf16.msra.mxu1 %v709_v45  ;;  %v590_v44 = vld [vmem:[#allocation4] sm:$0xff]  ;;  %v640_v45 = vld [vmem:[#allocation4 + $0x190] sm:$0xff] }
 0x146   :  { %798 = vmatprep.subr.bf16.mxu0 %v687_v46  ;;  %2364 = vmatprep.subr.bf16.mxu1 %v2553_v0  ;;  %v594_v46 = vld [vmem:[#allocation4 + $0x20] sm:$0xff] }
 0x149   :  { %799 = vmatpush1.bf16.msra.mxu0 %v686_v49  ;;  %2365 = vmatpush3.bf16.msra.mxu1 %v712_v50  ;;  %v597_v49 = vld [vmem:[#allocation4 + $0x38] sm:$0xff]  ;;  %v596_v50 = vld [vmem:[#allocation4 + $0x30] sm:$0xff] }
 0x14a   :  { %800 = vmatprep.subr.bf16.mxu0 %v690_v53  ;;  %2249 = vmatprep.subr.bf16.mxu1 %v616_v54  ;;  %v600_v53 = vld [vmem:[#allocation4 + $0x50] sm:$0xff]  ;;  %v599_v54 = vld [vmem:[#allocation4 + $0x48] sm:$0xff] }
 0x14c   :  { %2367 = vmatmul.mubr.msk.bf16.vlgmr.msra.gmra.mrb[16].mxu1 %vm772_vm7, %v2789_v2 }
 0x14d   :  { %801 = vmatpush1.bf16.msra.mxu0 %v689_v5  ;;  %2250 = vmatpush3.bf16.msra.mxu1 %v592_v6  ;;  %v1124_v5 = vld [vmem:[#allocation4 + $0x3e8] sm:$0xff]  ;;  %v609_v6 = vld [vmem:[#allocation4 + $0x98] sm:$0xff] }
 0x14e   :  { %802 = vmatprep.subr.bf16.mxu0 %v693_v11  ;;  %2251 = vmatprep.subr.bf16.mxu1 %v619_v12  ;;  %v608_v11 = vld [vmem:[#allocation4 + $0x90] sm:$0xff]  ;;  %v1127_v12 = vld [vmem:[#allocation4 + $0x400] sm:$0xff] }
 0x14f   :  { %1066 = vmatprep.mubr.bf16.mxu1 %v2748_v55 }
 0x151   :  { %803 = vmatpush1.bf16.msra.mxu0 %v692_v15  ;;  %2252 = vmatpush3.bf16.msra.mxu1 %v595_v16  ;;  %v1130_v15 = vld [vmem:[#allocation4 + $0x418] sm:$0xff]  ;;  %v615_v16 = vld [vmem:[#allocation4 + $0xc8] sm:$0xff] }
 0x152   :  { %804 = vmatprep.subr.bf16.mxu0 %v696_v17  ;;  %2253 = vmatprep.subr.bf16.mxu1 %v622_v18  ;;  %v1157_v17 = vld [vmem:[#allocation4 + $0x4f0] sm:$0xff]  ;;  %v614_v18 = vld [vmem:[#allocation4 + $0xc0] sm:$0xff] }
 0x155   :  { %805 = vmatpush1.bf16.msra.mxu0 %v695_v20  ;;  %2254 = vmatpush3.bf16.msra.mxu1 %v598_v21  ;;  %v1133_v20 = vld [vmem:[#allocation4 + $0x430] sm:$0xff]  ;;  %v618_v21 = vld [vmem:[#allocation4 + $0xe0] sm:$0xff] }
 0x156   :  { %806 = vmatprep.subr.bf16.mxu0 %v699_v22  ;;  %2255 = vmatprep.subr.bf16.mxu1 %v625_v23  ;;  %v1160_v22 = vld [vmem:[#allocation4 + $0x508] sm:$0xff]  ;;  %v617_v23 = vld [vmem:[#allocation4 + $0xd8] sm:$0xff] }
 0x159   :  { %807 = vmatpush1.bf16.msra.mxu0 %v698_v24  ;;  %2256 = vmatpush3.bf16.msra.mxu1 %v601_v25  ;;  %v1136_v24 = vld [vmem:[#allocation4 + $0x448] sm:$0xff]  ;;  %v621_v25 = vld [vmem:[#allocation4 + $0xf8] sm:$0xff] }
 0x15a   :  { %819 = vmatprep.subr.bf16.mxu0 %v702_v26  ;;  %2257 = vmatprep.subr.bf16.mxu1 %v628_v27  ;;  %v1163_v26 = vld [vmem:[#allocation4 + $0x520] sm:$0xff]  ;;  %v620_v27 = vld [vmem:[#allocation4 + $0xf0] sm:$0xff] }
 0x15c   :  { %809 = vmatmul.mubr.bf16.vlgmr.msra.gmra.mrb[4].mxu0 %v2767_v31  ;;  %v710_v31 = vld [vmem:[#allocation4 + $0x3a8] sm:$0xff] }
 0x15d   :  { %820 = vmatpush1.bf16.msra.mxu0 %v701_v28  ;;  %2258 = vmatpush3.bf16.msra.mxu1 %v604_v29  ;;  %v1139_v28 = vld [vmem:[#allocation4 + $0x460] sm:$0xff]  ;;  %v624_v29 = vld [vmem:[#allocation4 + $0x110] sm:$0xff] }
 0x15e   :  { %821 = vmatprep.subr.bf16.mxu0 %v705_v30  ;;  %2259 = vmatprep.subr.bf16.mxu1 %v631_v33  ;;  %v1166_v30 = vld [vmem:[#allocation4 + $0x538] sm:$0xff]  ;;  %v623_v33 = vld [vmem:[#allocation4 + $0x108] sm:$0xff] }
 0x15f   :  { %851 = vmatprep.mubr.bf16.mxu0 %v2556_v1 }
 0x161   :  { %822 = vmatpush1.bf16.msra.mxu0 %v704_v34  ;;  %2260 = vmatpush3.bf16.msra.mxu1 %v607_v35  ;;  %v1142_v34 = vld [vmem:[#allocation4 + $0x478] sm:$0xff]  ;;  %v627_v35 = vld [vmem:[#allocation4 + $0x128] sm:$0xff] }
 0x162   :  { %823 = vmatprep.subr.bf16.mxu0 %v708_v36  ;;  %2261 = vmatprep.subr.bf16.mxu1 %v634_v37  ;;  %v626_v36 = vld [vmem:[#allocation4 + $0x120] sm:$0xff]  ;;  %v1169_v37 = vld [vmem:[#allocation4 + $0x550] sm:$0xff] }
 0x165   :  { %824 = vmatpush1.bf16.msra.mxu0 %v707_v38  ;;  %2262 = vmatpush3.bf16.msra.mxu1 %v610_v39  ;;  %v630_v38 = vld [vmem:[#allocation4 + $0x140] sm:$0xff]  ;;  %v629_v39 = vld [vmem:[#allocation4 + $0x138] sm:$0xff] }
 0x166   :  { %825 = vmatprep.subr.bf16.mxu0 %v711_v40  ;;  %2263 = vmatprep.subr.bf16.mxu1 %v637_v41  ;;  %v1172_v40 = vld [vmem:[#allocation4 + $0x568] sm:$0xff]  ;;  %v633_v41 = vld [vmem:[#allocation4 + $0x158] sm:$0xff] }
 0x169   :  { %826 = vmatpush1.bf16.msra.mxu0 %v710_v31  ;;  %2264 = vmatpush3.bf16.msra.mxu1 %v613_v42  ;;  %v632_v31 = vld [vmem:[#allocation4 + $0x150] sm:$0xff]  ;;  %v1175_v42 = vld [vmem:[#allocation4 + $0x580] sm:$0xff] }
 0x16a   :  { %948 = vmatprep.subr.bf16.mxu0 %v591_v43  ;;  %2370 = vmatprep.subr.bf16.mxu1 %v2553_v0  ;;  %v636_v43 = vld [vmem:[#allocation4 + $0x170] sm:$0xff] }
 0x16c   :  { %2175 = vmatmul.mubr.msk.bf16.vlgmr.msra.gmra.mrb[4].mxu0 %vm772_vm7, %v2789_v2  ;;  %1067 = vmatmul.mubr.bf16.vlgmr.msra.gmra.mrb[20].mxu1 %v2756_v61  ;;  %v606_v2 = vld [vmem:[#allocation4 + $0x80] sm:$0xff] }
 0x16d   :  { %949 = vmatpush1.bf16.msra.mxu0 %v590_v44  ;;  %2371 = vmatpush3.bf16.msra.mxu1 %v640_v45  ;;  %v635_v44 = vld [vmem:[#allocation4 + $0x168] sm:$0xff]  ;;  %v1178_v45 = vld [vmem:[#allocation4 + $0x598] sm:$0xff] }
 0x16e   :  { %950 = vmatprep.subr.bf16.mxu0 %v594_v46  ;;  %2372 = vmatprep.subr.bf16.mxu1 %v2553_v0  ;;  %v639_v46 = vld [vmem:[#allocation4 + $0x188] sm:$0xff] }
 0x16f   :  { %2378 = vmatprep.mubr.msk.bf16.mxu1 %vm2555_vm0, %v2553_v0  ;;  %980 = vmatprep.mubr.bf16.mxu0 %v2748_v55  ;;  %v602_v55 = vld [vmem:[#allocation4 + $0x60] sm:$0xff] }
 0x171   :  { %951 = vmatpush1.bf16.msra.mxu0 %v593_v47  ;;  %2373 = vmatpush3.bf16.msra.mxu1 %v643_v48  ;;  %v638_v47 = vld [vmem:[#allocation4 + $0x180] sm:$0xff] }
 0x172   :  { %952 = vmatprep.subr.bf16.mxu0 %v597_v49  ;;  %2374 = vmatprep.subr.bf16.mxu1 %v2553_v0  ;;  %v642_v48 = vld [vmem:[#allocation4 + $0x1a0] sm:$0xff]  ;;  %v641_v49 = vld [vmem:[#allocation4 + $0x198] sm:$0xff] }
 0x175   :  { %953 = vmatpush1.bf16.msra.mxu0 %v596_v50  ;;  %2375 = vmatpush3.bf16.msra.mxu1 %v646_v52  ;;  %v645_v50 = vld [vmem:[#allocation4 + $0x1b8] sm:$0xff]  ;;  %v644_v52 = vld [vmem:[#allocation4 + $0x1b0] sm:$0xff] }
 0x176   :  { %954 = vmatprep.subr.bf16.mxu0 %v600_v53  ;;  %2376 = vmatprep.subr.bf16.mxu1 %v2553_v0  ;;  %v648_v53 = vld [vmem:[#allocation4 + $0x1d0] sm:$0xff] }
 0x179   :  { %955 = vmatpush1.bf16.msra.mxu0 %v599_v54  ;;  %2377 = vmatpush3.bf16.msra.mxu1 %v649_v58  ;;  %v647_v54 = vld [vmem:[#allocation4 + $0x1c8] sm:$0xff] }
 0x17a   :  { %956 = vmatprep.subr.bf16.mxu0 %v603_v59  ;;  %2276 = vmatprep.subr.bf16.mxu1 %v1145_v60  ;;  %v1120_v58 = vld [vmem:[#allocation4 + $0x3c8] sm:$0xff]  ;;  %v1119_v59 = vld [vmem:[#allocation4 + $0x3c0] sm:$0xff] }
 0x17b   :  { %v1123_v60 = vld [vmem:[#allocation4 + $0x3e0] sm:$0xff] }
 0x17c   :  { %2379 = vmatmul.mubr.msk.bf16.vlgmr.msra.gmra.mrb[24].mxu1 %vm772_vm7, %v2770_v32 }
 0x17d   :  { %957 = vmatpush1.bf16.msra.mxu0 %v602_v55  ;;  %2277 = vmatpush3.bf16.msra.mxu1 %v1121_v62  ;;  %v1126_v55 = vld [vmem:[#allocation4 + $0x3f8] sm:$0xff]  ;;  %v1125_v62 = vld [vmem:[#allocation4 + $0x3f0] sm:$0xff] }
 0x17e   :  { %958 = vmatprep.subr.bf16.mxu0 %v606_v2  ;;  %2278 = vmatprep.subr.bf16.mxu1 %v1148_v3  ;;  %v1129_v2 = vld [vmem:[#allocation4 + $0x410] sm:$0xff]  ;;  %v1128_v3 = vld [vmem:[#allocation4 + $0x408] sm:$0xff] }
 0x17f   :  { %1319 = vmatprep.mubr.bf16.mxu1 %v2792_v57 }
 0x181   :  { %959 = vmatpush1.bf16.msra.mxu0 %v605_v4  ;;  %2279 = vmatpush3.bf16.msra.mxu1 %v1124_v5  ;;  %v1132_v4 = vld [vmem:[#allocation4 + $0x428] sm:$0xff]  ;;  %v1131_v5 = vld [vmem:[#allocation4 + $0x420] sm:$0xff] }
 0x182   :  { %960 = vmatprep.subr.bf16.mxu0 %v609_v6  ;;  %2280 = vmatprep.subr.bf16.mxu1 %v1151_v8  ;;  %v1135_v6 = vld [vmem:[#allocation4 + $0x440] sm:$0xff]  ;;  %v1138_v8 = vld [vmem:[#allocation4 + $0x458] sm:$0xff] }
 0x185   :  { %961 = vmatpush1.bf16.msra.mxu0 %v608_v11  ;;  %2281 = vmatpush3.bf16.msra.mxu1 %v1127_v12  ;;  %v1141_v11 = vld [vmem:[#allocation4 + $0x470] sm:$0xff]  ;;  %v1140_v12 = vld [vmem:[#allocation4 + $0x468] sm:$0xff] }
 0x186   :  { %962 = vmatprep.subr.bf16.mxu0 %v612_v10  ;;  %2282 = vmatprep.subr.bf16.mxu1 %v1154_v13  ;;  %v1144_v10 = vld [vmem:[#allocation4 + $0x488] sm:$0xff]  ;;  %v1143_v13 = vld [vmem:[#allocation4 + $0x480] sm:$0xff] }
 0x189   :  { %963 = vmatpush1.bf16.msra.mxu0 %v611_v14  ;;  %2283 = vmatpush3.bf16.msra.mxu1 %v1130_v15  ;;  %v1147_v14 = vld [vmem:[#allocation4 + $0x4a0] sm:$0xff]  ;;  %v1146_v15 = vld [vmem:[#allocation4 + $0x498] sm:$0xff] }
 0x18a   :  { %964 = vmatprep.subr.bf16.mxu0 %v615_v16  ;;  %2284 = vmatprep.subr.bf16.mxu1 %v1157_v17  ;;  %v1150_v16 = vld [vmem:[#allocation4 + $0x4b8] sm:$0xff]  ;;  %v1149_v17 = vld [vmem:[#allocation4 + $0x4b0] sm:$0xff] }
 0x18d   :  { %965 = vmatpush1.bf16.msra.mxu0 %v614_v18  ;;  %2285 = vmatpush3.bf16.msra.mxu1 %v1133_v20  ;;  %v1153_v18 = vld [vmem:[#allocation4 + $0x4d0] sm:$0xff]  ;;  %v1152_v20 = vld [vmem:[#allocation4 + $0x4c8] sm:$0xff] }
 0x18e   :  { %966 = vmatprep.subr.bf16.mxu0 %v618_v21  ;;  %2286 = vmatprep.subr.bf16.mxu1 %v1160_v22  ;;  %v1156_v21 = vld [vmem:[#allocation4 + $0x4e8] sm:$0xff]  ;;  %v1155_v22 = vld [vmem:[#allocation4 + $0x4e0] sm:$0xff] }
 0x191   :  { %967 = vmatpush1.bf16.msra.mxu0 %v617_v23  ;;  %2287 = vmatpush3.bf16.msra.mxu1 %v1136_v24  ;;  %v1159_v23 = vld [vmem:[#allocation4 + $0x500] sm:$0xff]  ;;  %v1158_v24 = vld [vmem:[#allocation4 + $0x4f8] sm:$0xff] }
 0x192   :  { %968 = vmatprep.subr.bf16.mxu0 %v621_v25  ;;  %2288 = vmatprep.subr.bf16.mxu1 %v1163_v26  ;;  %v1162_v25 = vld [vmem:[#allocation4 + $0x518] sm:$0xff]  ;;  %v1161_v26 = vld [vmem:[#allocation4 + $0x510] sm:$0xff] }
 0x195   :  { %969 = vmatpush1.bf16.msra.mxu0 %v620_v27  ;;  %2289 = vmatpush3.bf16.msra.mxu1 %v1139_v28  ;;  %v1165_v27 = vld [vmem:[#allocation4 + $0x530] sm:$0xff]  ;;  %v1164_v28 = vld [vmem:[#allocation4 + $0x528] sm:$0xff] }
 0x196   :  { %970 = vmatprep.subr.bf16.mxu0 %v624_v29  ;;  %2290 = vmatprep.subr.bf16.mxu1 %v1166_v30  ;;  %v1168_v29 = vld [vmem:[#allocation4 + $0x548] sm:$0xff]  ;;  %v1167_v30 = vld [vmem:[#allocation4 + $0x540] sm:$0xff] }
 0x199   :  { %971 = vmatpush1.bf16.msra.mxu0 %v623_v33  ;;  %2291 = vmatpush3.bf16.msra.mxu1 %v1142_v34  ;;  %v1171_v33 = vld [vmem:[#allocation4 + $0x560] sm:$0xff]  ;;  %v1170_v34 = vld [vmem:[#allocation4 + $0x558] sm:$0xff] }
 0x19a   :  { %972 = vmatprep.subr.bf16.mxu0 %v627_v35  ;;  %2382 = vmatprep.subr.bf16.mxu1 %v2553_v0  ;;  %v1174_v35 = vld [vmem:[#allocation4 + $0x578] sm:$0xff] }
 0x19c   :  { %1320 = vmatmul.mubr.bf16.vlgmr.msra.gmra.mrb[28].mxu1 %v2795_v51 }
 0x19d   :  { %973 = vmatpush1.bf16.msra.mxu0 %v626_v36  ;;  %2383 = vmatpush3.bf16.msra.mxu1 %v1169_v37  ;;  %v1173_v36 = vld [vmem:[#allocation4 + $0x570] sm:$0xff] }
 0x19e   :  { %974 = vmatprep.subr.bf16.mxu0 %v630_v38  ;;  %2384 = vmatprep.subr.bf16.mxu1 %v2553_v0  ;;  %v1177_v37 = vld [vmem:[#allocation4 + $0x590] sm:$0xff]  ;;  %v1176_v38 = vld [vmem:[#allocation4 + $0x588] sm:$0xff] }
 0x19f   :  { %2390 = vmatprep.mubr.msk.bf16.mxu1 %vm2555_vm0, %v2553_v0 }
 0x1a1   :  { %975 = vmatpush1.bf16.msra.mxu0 %v629_v39  ;;  %2385 = vmatpush3.bf16.msra.mxu1 %v1172_v40 }
 0x1a2   :  { %976 = vmatprep.subr.bf16.mxu0 %v633_v41  ;;  %2386 = vmatprep.subr.bf16.mxu1 %v2553_v0 }
 0x1a5   :  { %977 = vmatpush1.bf16.msra.mxu0 %v632_v31  ;;  %2387 = vmatpush3.bf16.msra.mxu1 %v1175_v42 }
 0x1a6   :  { %978 = vmatprep.subr.bf16.mxu0 %v636_v43  ;;  %2388 = vmatprep.subr.bf16.mxu1 %v2553_v0 }
 0x1a9   :  { %979 = vmatpush1.bf16.msra.mxu0 %v635_v44  ;;  %2389 = vmatpush3.bf16.msra.mxu1 %v1178_v45 }
 0x1aa   :  { %991 = vmatprep.subr.bf16.mxu0 %v639_v46 }
 0x1ac   :  { %2391 = vmatmul.mubr.msk.bf16.vlgmr.msra.gmra.mrb[32].mxu1 %vm772_vm7, %v2803_v19  ;;  %981 = vmatmul.mubr.bf16.vlgmr.msra.gmra.mrb[4].mxu0 %v2756_v61  ;;  %v1122_v61 = vld [vmem:[#allocation4 + $0x3d8] sm:$0xff] }
 0x1ad   :  { %992 = vmatpush1.bf16.msra.mxu0 %v638_v47  ;;  %1023 = vmatprep.mubr.bf16.mxu0 %v2556_v1 }
 0x1ae   :  { %993 = vmatprep.subr.bf16.mxu0 %v642_v48 }
 0x1b1   :  { %994 = vmatpush1.bf16.msra.mxu0 %v641_v49 }
 0x1b2   :  { %995 = vmatprep.subr.bf16.mxu0 %v645_v50 }
 0x1b5   :  { %996 = vmatpush1.bf16.msra.mxu0 %v644_v52 }
 0x1b6   :  { %997 = vmatprep.subr.bf16.mxu0 %v648_v53 }
 0x1b9   :  { %998 = vmatpush1.bf16.msra.mxu0 %v647_v54 }
 0x1ba   :  { %1201 = vmatprep.subr.bf16.mxu0 %v1120_v58 }
 0x1bc   :  { %2177 = vmatmul.mubr.msk.bf16.vlgmr.msra.gmra.mrb[4].mxu0 %vm772_vm7, %v2770_v32  ;;  %v1134_v32 = vld [vmem:[#allocation4 + $0x438] sm:$0xff] }
 0x1bd   :  { %1202 = vmatpush1.bf16.msra.mxu0 %v1119_v59  ;;  %1233 = vmatprep.mubr.bf16.mxu0 %v2792_v57  ;;  %v1137_v57 = vld [vmem:[#allocation4 + $0x450] sm:$0xff] }
 0x1be   :  { %1203 = vmatprep.subr.bf16.mxu0 %v1123_v60 }
 0x1c1   :  { %1204 = vmatpush1.bf16.msra.mxu0 %v1122_v61 }
 0x1c2   :  { %1205 = vmatprep.subr.bf16.mxu0 %v1126_v55 }
 0x1c5   :  { %1206 = vmatpush1.bf16.msra.mxu0 %v1125_v62 }
 0x1c6   :  { %1207 = vmatprep.subr.bf16.mxu0 %v1129_v2 }
 0x1c9   :  { %1208 = vmatpush1.bf16.msra.mxu0 %v1128_v3 }
 0x1ca   :  { %1209 = vmatprep.subr.bf16.mxu0 %v1132_v4 }
 0x1cd   :  { %1210 = vmatpush1.bf16.msra.mxu0 %v1131_v5 }
 0x1ce   :  { %1211 = vmatprep.subr.bf16.mxu0 %v1135_v6 }
 0x1d1   :  { %1212 = vmatpush1.bf16.msra.mxu0 %v1134_v32 }
 0x1d2   :  { %1213 = vmatprep.subr.bf16.mxu0 %v1138_v8 }
 0x1d5   :  { %1214 = vmatpush1.bf16.msra.mxu0 %v1137_v57 }
 0x1d6   :  { %1215 = vmatprep.subr.bf16.mxu0 %v1141_v11  ;;  %v585_v11 = vld [vmem:[%s2921_s2 + $0x3] sm:$0x7] }
 0x1d9   :  { %1216 = vmatpush1.bf16.msra.mxu0 %v1140_v12 }
 0x1da   :  { %1217 = vmatprep.subr.bf16.mxu0 %v1144_v10 }
 0x1dd   :  { %1218 = vmatpush1.bf16.msra.mxu0 %v1143_v13  ;;  %v1387_v13 = vrot.slane %v585_v11, %v539_v63 }
 0x1de   :  { %1219 = vmatprep.subr.bf16.mxu0 %v1147_v14 }
 0x1e1   :  { %1220 = vmatpush1.bf16.msra.mxu0 %v1146_v15 }
 0x1e2   :  { %1221 = vmatprep.subr.bf16.mxu0 %v1150_v16 }
 0x1e5   :  { %1222 = vmatpush1.bf16.msra.mxu0 %v1149_v17 }
 0x1e6   :  { %1223 = vmatprep.subr.bf16.mxu0 %v1153_v18 }
 0x1e9   :  { %1224 = vmatpush1.bf16.msra.mxu0 %v1152_v20 }
 0x1ea   :  { %1225 = vmatprep.subr.bf16.mxu0 %v1156_v21 }
 0x1ed   :  { %1226 = vmatpush1.bf16.msra.mxu0 %v1155_v22 }
 0x1ee   :  { %1227 = vmatprep.subr.bf16.mxu0 %v1159_v23 }
 0x1f1   :  { %1228 = vmatpush1.bf16.msra.mxu0 %v1158_v24 }
 0x1f2   :  { %1229 = vmatprep.subr.bf16.mxu0 %v1162_v25 }
 0x1f5   :  { %1230 = vmatpush1.bf16.msra.mxu0 %v1161_v26 }
 0x1f6   :  { %1231 = vmatprep.subr.bf16.mxu0 %v1165_v27  ;;  %v1379_v27 = vrot.slane %v585_v11, %v2736_v7 }
 0x1f9   :  { %1232 = vmatpush1.bf16.msra.mxu0 %v1164_v28  ;;  %v1383_v28 = vrot.slane %v585_v11, %v2739_v9 }
 0x1fa   :  { %1244 = vmatprep.subr.bf16.mxu0 %v1168_v29 }
 0x1fc   :  { %1234 = vmatmul.mubr.bf16.vlgmr.msra.gmra.mrb[4].mxu0 %v2795_v51 }
 0x1fd   :  { %1245 = vmatpush1.bf16.msra.mxu0 %v1167_v30  ;;  %1276 = vmatprep.mubr.bf16.mxu0 %v2556_v1 }
 0x1fe   :  { %1246 = vmatprep.subr.bf16.mxu0 %v1171_v33 }
 0x201   :  { %1247 = vmatpush1.bf16.msra.mxu0 %v1170_v34 }
 0x202   :  { %1248 = vmatprep.subr.bf16.mxu0 %v1174_v35 }
 0x205   :  { %1249 = vmatpush1.bf16.msra.mxu0 %v1173_v36 }
 0x206   :  { %1250 = vmatprep.subr.bf16.mxu0 %v1177_v37 }
 0x209   :  { %1251 = vmatpush1.bf16.msra.mxu0 %v1176_v38 }
 0x20c   :  { %2182 = vmatmul.mubr.msk.bf16.vlgmr.msra.gmra.mrb[4].mxu0 %vm772_vm7, %v2803_v19 }
 0x20f   :  { %v2238_v39 = vpop.f32.mrb[12].mxu1 }
 0x210   :  { %v2239_v40 = vpop.f32.mrb[13].mxu1 }
 0x211   :  { %v2240_v51 = vadd.f32 %v2239_v40, %v2238_v39  ;;  %v2241_v41 = vpop.f32.mrb[14].mxu1 }
 0x212   :  { %v2242_v31 = vpop.f32.mrb[15].mxu1 }
 0x213   :  { %v2243_v42 = vadd.f32 %v2242_v31, %v2241_v41 }
 0x21f   :  { %v937_v43 = vpop.f32.mrb[16].mxu1 }
 0x220   :  { %v938_v44 = vadd.f32 %v2240_v51, %v937_v43  ;;  %v2368_v45 = vpop.f32.mrb[17].mxu1 }
 0x221   :  { %v940_v46 = vpop.f32.mrb[18].mxu1 }
 0x222   :  { %v941_v47 = vadd.f32 %v2243_v42, %v940_v46  ;;  %v2369_v48 = vpop.f32.mrb[19].mxu1 }
 0x23f   :  { %v2265_v49 = vpop.f32.mrb[20].mxu1 }
 0x240   :  { %v2266_v50 = vpop.f32.mrb[21].mxu1 }
 0x241   :  { %v2267_v52 = vadd.f32 %v2266_v50, %v2265_v49  ;;  %v2268_v53 = vpop.f32.mrb[22].mxu1 }
 0x242   :  { %v2269_v54 = vpop.f32.mrb[23].mxu1 }
 0x243   :  { %v2270_v58 = vadd.f32 %v2269_v54, %v2268_v53  ;;  %v1069_v59 = vadd.f32 %v2267_v52, %v938_v44 }
 0x245   :  { %v1072_v19 = vadd.f32 %v2270_v58, %v941_v47 }
 0x24f   :  { %v1109_v60 = vpop.f32.mrb[24].mxu1 }
 0x250   :  { %v1110_v61 = vadd.f32 %v1109_v60, %v1069_v59  ;;  %v2380_v55 = vpop.f32.mrb[25].mxu1 }
 0x251   :  { %v1112_v62 = vpop.f32.mrb[26].mxu1 }
 0x252   :  { %v1113_v2 = vadd.f32 %v1112_v62, %v1072_v19  ;;  %v2381_v3 = vpop.f32.mrb[27].mxu1 }
 0x26f   :  { %v2292_v4 = vpop.f32.mrb[28].mxu1 }
 0x270   :  { %v2293_v5 = vpop.f32.mrb[29].mxu1 }
 0x271   :  { %v2294_v6 = vadd.f32 %v2293_v5, %v2292_v4  ;;  %v2295_v32 = vpop.f32.mrb[30].mxu1 }
 0x272   :  { %v2296_v8 = vpop.f32.mrb[31].mxu1 }
 0x273   :  { %v2297_v57 = vadd.f32 %v2296_v8, %v2295_v32 }
 0x27f   :  { %v1362_v12 = vpop.f32.mrb[32].mxu1 }
 0x280   :  { %v1363_v10 = vadd.f32 %v2294_v6, %v1362_v12  ;;  %v2392_v14 = vpop.f32.mrb[33].mxu1 }
 0x281   :  { %v1365_v15 = vpop.f32.mrb[34].mxu1 }
 0x282   :  { %v1371_v16 = vadd.f32 %v1363_v10, %v1110_v61  ;;  %v1366_v17 = vadd.f32 %v2297_v57, %v1365_v15  ;;  %v2393_v18 = vpop.f32.mrb[35].mxu1 }
 0x284   :  { %v1393_v20 = vadd.f32 %v1387_v13, %v1371_v16  ;;  %v1374_v21 = vadd.f32 %v1366_v17, %v1113_v2 }
 0x286   :  { %v1399_v22 = vmax.f32 %v1393_v20, 0.0  ;;  %v1396_v23 = vadd.f32 %v1387_v13, %v1374_v21 }
 0x288   :  { %v2210_v24 = vpack.c.bf16 %v1399_v22, %v1399_v22  ;;  %v1402_v25 = vmax.f32 %v1396_v23, 0.0 }
 0x28a   :  { %1424 = vst [vmem:[#allocation3 + $0x8] sm:$0xf] %v2210_v24  ;;  %v2212_v26 = vpack.c.bf16 %v1402_v25, %v1402_v25 }
 0x28c   :  { %1426 = vst [vmem:[#allocation3 + $0x14] sm:$0xf] %v2212_v26 }
 0x2df   :  { %v1278_v56 = vpop.f32.mrb[4].mxu0 }
 0x2e0   :  { %v1391_v63 = vadd.f32 %v1379_v27, %v1278_v56  ;;  %v1280_v29 = vpop.f32.mrb[5].mxu0 }
 0x2e1   :  { %v1392_v30 = vadd.f32 %v1383_v28, %v1280_v29  ;;  %v1282_v33 = vpop.f32.mrb[6].mxu0 }
 0x2e2   :  { %v1397_v34 = vmax.f32 %v1391_v63, 0.0  ;;  %v1394_v35 = vadd.f32 %v1379_v27, %v1282_v33  ;;  %v1284_v36 = vpop.f32.mrb[7].mxu0 }
 0x2e3   :  { %v1398_v37 = vmax.f32 %v1392_v30, 0.0  ;;  %v1395_v38 = vadd.f32 %v1383_v28, %v1284_v36 }
 0x2e4   :  { %v1400_v39 = vmax.f32 %v1394_v35, 0.0 }
 0x2e5   :  { %v2209_v40 = vpack.c.bf16 %v1398_v37, %v1397_v34  ;;  %v1401_v51 = vmax.f32 %v1395_v38, 0.0 }
 0x2e7   :  { %1423 = vst [vmem:[#allocation3] sm:$0xff] %v2209_v40  ;;  %v2211_v41 = vpack.c.bf16 %v1401_v51, %v1400_v39 }
 0x2e9   :  { %1425 = vst [vmem:[#allocation3 + $0xc] sm:$0xff] %v2211_v41 }
 0x2ea   :  { %2548 = dma.done.wait [#allocation7 + $0x1], 18432 }
 0x2eb   :  { %2549 = vsyncadd [#allocation7 + $0x1], 4294948864  ;;  %1674 = vmatprep.mubr.bf16.mxu1 %v2556_v1  ;;  %v1524_v31 = vld [vmem:[#allocation5 + $0x288] sm:$0xff]  ;;  %v1523_v42 = vld [vmem:[#allocation5 + $0x280] sm:$0xff] }
 0x2ec   :  { %v1526_v43 = vld [vmem:[#allocation5 + $0x298] sm:$0xff]  ;;  %1642 = vmatprep.subr.bf16.mxu1 %v1524_v31  ;;  %v1525_v44 = vld [vmem:[#allocation5 + $0x290] sm:$0xff]  ;;  %v1528_v45 = vld [vmem:[#allocation5 + $0x2a8] sm:$0xff] }
 0x2ed   :  { %1643 = vmatpush1.bf16.msra.mxu1 %v1523_v42  ;;  %v1527_v46 = vld [vmem:[#allocation5 + $0x2a0] sm:$0xff]  ;;  %v1530_v47 = vld [vmem:[#allocation5 + $0x2b8] sm:$0xff]  ;;  %v1529_v48 = vld [vmem:[#allocation5 + $0x2b0] sm:$0xff] }
 0x2ee   :  { %1644 = vmatprep.subr.bf16.mxu1 %v1526_v43  ;;  %v1485_v49 = vld [vmem:[#allocation3 + $0x8] sm:$0xf]  ;;  %v2846_v50 = vld [vmem:[#allocation3 + $0x14] sm:$0xf]  ;;  %v1532_v52 = vld [vmem:[#allocation5 + $0x2c8] sm:$0xff] }
 0x2ef   :  { %v2190_v53 = vcombine.low %v1485_v49, %v2846_v50  ;;  %v1531_v54 = vld [vmem:[#allocation5 + $0x2c0] sm:$0xff]  ;;  %v1534_v58 = vld [vmem:[#allocation5 + $0x2d8] sm:$0xff]  ;;  %v1533_v60 = vld [vmem:[#allocation5 + $0x2d0] sm:$0xff] }
 0x2f0   :  { %v2849_v59 = vld [vmem:[#allocation3 + $0x20] ss:$0 sps:$4 sm:$0x11]   ;;  %v1536_v61 = vld [vmem:[#allocation5 + $0x2e8] sm:$0xff]  ;;  %v1535_v3 = vld [vmem:[#allocation5 + $0x2e0] sm:$0xff] }
 0x2f1   :  { %1645 = vmatpush1.bf16.msra.mxu1 %v1525_v44  ;;  %v1587_v19 = vshll.u32 %v2190_v53, 16  ;;  %v1585_v55 = vshrl.u32 %v2190_v53, 16  ;;  %v1592_v2 = vshll.u32 %v2849_v59, 16  ;;  %v1538_v4 = vld [vmem:[#allocation5 + $0x2f8] sm:$0xff]  ;;  %v1537_v32 = vld [vmem:[#allocation5 + $0x2f0] sm:$0xff]  ;;  %v2854_v57 = vld [vmem:[#allocation3 + $0xc] sm:$0xff] }
 0x2f2   :  { %1646 = vmatprep.subr.bf16.mxu1 %v1528_v45  ;;  %v2852_v8 = vld [vmem:[#allocation3] sm:$0xff]  ;;  %v1437_v11 = vld [vmem:[#allocation5 + $0x8] sm:$0xff]  ;;  %v1493_v18 = vld [vmem:[#allocation5 + $0x190] sm:$0xff] }
 0x2f3   :  { %v1589_v62 = vrot.slane %v1587_v19, 1  ;;  %v1594_v6 = vrot.slane %v1592_v2, 1  ;;  %v1492_v12 = vld [vmem:[#allocation5 + $0x188] sm:$0xff]  ;;  %v2859_v13 = vcombine.high %v2852_v8, %v2854_v57  ;;  %v1491_v14 = vld [vmem:[#allocation5 + $0x180] sm:$0xff]  ;;  %v1494_v16 = vld [vmem:[#allocation5 + $0x198] sm:$0xff] }
 0x2f4   :  { %1599 = vmatprep.subr.bf16.mxu0 %v1492_v12  ;;  %v1436_v15 = vld [vmem:[#allocation5] sm:$0xff]  ;;  %v1439_v17 = vld [vmem:[#allocation5 + $0x18] sm:$0xff]  ;;  %v1438_v20 = vld [vmem:[#allocation5 + $0x10] sm:$0xff] }
 0x2f5   :  { %1647 = vmatpush1.bf16.msra.mxu1 %v1527_v46  ;;  %v1590_v5 = vor.u32 %v1589_v62, %v1585_v55  ;;  %1600 = vmatpush1.bf16.msra.mxu0 %v1491_v14  ;;  %v1496_v21 = vld [vmem:[#allocation5 + $0x1a8] sm:$0xff]  ;;  %v1495_v23 = vld [vmem:[#allocation5 + $0x1a0] sm:$0xff]  ;;  %v1498_v25 = vld [vmem:[#allocation5 + $0x1b8] sm:$0xff] }
 0x2f6   :  { %1648 = vmatprep.subr.bf16.mxu1 %v1530_v47  ;;  %1601 = vmatprep.subr.bf16.mxu0 %v1494_v16  ;;  %v1441_v22 = vld [vmem:[#allocation5 + $0x28] sm:$0xff]  ;;  %v1440_v24 = vld [vmem:[#allocation5 + $0x20] sm:$0xff]  ;;  %v1443_v26 = vld [vmem:[#allocation5 + $0x38] sm:$0xff] }
 0x2f7   :  { %v1595_v10 = vsel %vm130_vm3, %v1590_v5, %v1594_v6  ;;  %v1497_v27 = vld [vmem:[#allocation5 + $0x1b0] sm:$0xff]  ;;  %v1500_v56 = vld [vmem:[#allocation5 + $0x1c8] sm:$0xff]  ;;  %v1499_v29 = vld [vmem:[#allocation5 + $0x1c0] sm:$0xff] }
 0x2f8   :  { %v1442_v28 = vld [vmem:[#allocation5 + $0x30] sm:$0xff]  ;;  %v1445_v63 = vld [vmem:[#allocation5 + $0x48] sm:$0xff]  ;;  %v1444_v30 = vld [vmem:[#allocation5 + $0x40] sm:$0xff] }
 0x2f9   :  { %1649 = vmatpush1.bf16.msra.mxu1 %v1529_v48  ;;  %1602 = vmatpush1.bf16.msra.mxu0 %v1493_v18  ;;  %v1502_v33 = vld [vmem:[#allocation5 + $0x1d8] sm:$0xff]  ;;  %v1501_v35 = vld [vmem:[#allocation5 + $0x1d0] sm:$0xff]  ;;  %v1504_v37 = vld [vmem:[#allocation5 + $0x1e8] sm:$0xff] }
 0x2fa   :  { %1650 = vmatprep.subr.bf16.mxu1 %v1532_v52  ;;  %1603 = vmatprep.subr.bf16.mxu0 %v1496_v21  ;;  %v1447_v34 = vld [vmem:[#allocation5 + $0x58] sm:$0xff]  ;;  %v1446_v36 = vld [vmem:[#allocation5 + $0x50] sm:$0xff]  ;;  %v1449_v38 = vld [vmem:[#allocation5 + $0x68] sm:$0xff] }
 0x2fb   :  { %v1503_v39 = vld [vmem:[#allocation5 + $0x1e0] sm:$0xff]  ;;  %v1506_v51 = vld [vmem:[#allocation5 + $0x1f8] sm:$0xff]  ;;  %v1505_v31 = vld [vmem:[#allocation5 + $0x1f0] sm:$0xff] }
 0x2fc   :  { %v1448_v40 = vld [vmem:[#allocation5 + $0x60] sm:$0xff]  ;;  %v1451_v41 = vld [vmem:[#allocation5 + $0x78] sm:$0xff]  ;;  %v1450_v42 = vld [vmem:[#allocation5 + $0x70] sm:$0xff] }
 0x2fd   :  { %1651 = vmatpush1.bf16.msra.mxu1 %v1531_v54  ;;  %1604 = vmatpush1.bf16.msra.mxu0 %v1495_v23  ;;  %v1508_v43 = vld [vmem:[#allocation5 + $0x208] sm:$0xff]  ;;  %v1488_v44 = vld [vmem:[#allocation3 + $0x18] sm:$0x11]  ;;  %v2862_v46 = vld [vmem:[#allocation3] sm:$0xee]  ;;  %v2194_v23 = vcombine.low %v2852_v8, %v2854_v57 }
 0x2fe   :  { %1652 = vmatprep.subr.bf16.mxu1 %v1534_v58  ;;  %1605 = vmatprep.subr.bf16.mxu0 %v1498_v25  ;;  %v1453_v45 = vld [vmem:[#allocation5 + $0x88] sm:$0xff]  ;;  %v2864_v47 = vcombine.low %v1488_v44, %v1488_v44  ;;  %v2197_v48 = vcombine.low %v2862_v46, %v2854_v57  ;;  %v1507_v49 = vld [vmem:[#allocation5 + $0x200] sm:$0xff]  ;;  %v1510_v53 = vld [vmem:[#allocation5 + $0x218] sm:$0xff] }
 0x2ff   :  { %v1452_v52 = vld [vmem:[#allocation5 + $0x80] sm:$0xff]  ;;  %v1455_v19 = vld [vmem:[#allocation5 + $0x98] sm:$0xff]  ;;  %v1454_v55 = vld [vmem:[#allocation5 + $0x90] sm:$0xff] }
 0x300   :  { %v1846_v54 = vrot.slane %v2197_v48, 1  ;;  %v1847_v58 = vrot.slane %v2864_v47, 1  ;;  %v1512_v62 = vld [vmem:[#allocation5 + $0x228] sm:$0xff]  ;;  %v1514_v5 = vld [vmem:[#allocation5 + $0x238] sm:$0xff]  ;;  %v1515_v14 = vld [vmem:[#allocation5 + $0x240] sm:$0xff] }
 0x301   :  { %1653 = vmatpush1.bf16.msra.mxu1 %v1533_v60  ;;  %1606 = vmatpush1.bf16.msra.mxu0 %v1497_v27  ;;  %v1457_v2 = vld [vmem:[#allocation5 + $0xa8] sm:$0xff]  ;;  %v1459_v6 = vld [vmem:[#allocation5 + $0xb8] sm:$0xff]  ;;  %v1517_v18 = vld [vmem:[#allocation5 + $0x250] sm:$0xff] }
 0x302   :  { %1654 = vmatprep.subr.bf16.mxu1 %v1536_v61  ;;  %1607 = vmatprep.subr.bf16.mxu0 %v1500_v56  ;;  %v2870_v60 = vsel %vm398_vm5, %v1846_v54, %v1847_v58  ;;  %v1509_v61 = vld [vmem:[#allocation5 + $0x210] sm:$0xff]  ;;  %v1516_v12 = vld [vmem:[#allocation5 + $0x248] sm:$0xff]  ;;  %v1518_v16 = vld [vmem:[#allocation5 + $0x258] sm:$0xff]  ;;  %v1563_v56 = vshll.u32 %v2194_v23, 16 }
 0x303   :  { %v1520_v21 = vld [vmem:[#allocation5 + $0x268] sm:$0xff]  ;;  %v1519_v25 = vld [vmem:[#allocation5 + $0x260] sm:$0xff]  ;;  %v1475_v48 = vld [vmem:[#allocation5 + $0x138] sm:$0xff] }
 0x304   :  { %v1464_v27 = vld [vmem:[#allocation5 + $0xe0] sm:$0xff]  ;;  %v1565_v8 = vrot.slane %v1563_v56, 1  ;;  %v1479_v54 = vld [vmem:[#allocation5 + $0x158] sm:$0xff]  ;;  %v1478_v58 = vld [vmem:[#allocation5 + $0x150] sm:$0xff] }
 0x305   :  { %1655 = vmatpush1.bf16.msra.mxu1 %v1535_v3  ;;  %1608 = vmatpush1.bf16.msra.mxu0 %v1499_v29  ;;  %v1511_v3 = vld [vmem:[#allocation5 + $0x220] sm:$0xff]  ;;  %v1573_v29 = vshrl.u32 %v2859_v13, 16  ;;  %v1811_v56 = vld [vmem:[#allocation5 + $0x3a8] sm:$0xff] }
 0x306   :  { %1656 = vmatprep.subr.bf16.mxu1 %v1538_v4  ;;  %1609 = vmatprep.subr.bf16.mxu0 %v1502_v33  ;;  %v1456_v4 = vld [vmem:[#allocation5 + $0xa0] sm:$0xff] }
 0x309   :  { %1657 = vmatpush1.bf16.msra.mxu1 %v1537_v32  ;;  %1610 = vmatpush1.bf16.msra.mxu0 %v1501_v35  ;;  %v1513_v32 = vld [vmem:[#allocation5 + $0x230] sm:$0xff]  ;;  %v1568_v35 = vshll.u32 %v2864_v47, 16  ;;  %v1472_v47 = vld [vmem:[#allocation5 + $0x120] sm:$0xff] }
 0x30a   :  { %1701 = vmatprep.subr.bf16.mxu1 %v1437_v11  ;;  %1611 = vmatprep.subr.bf16.mxu0 %v1504_v37  ;;  %v1458_v11 = vld [vmem:[#allocation5 + $0xb0] sm:$0xff] }
 0x30c   :  { %1675 = vmatmul.mubr.bf16.vlgmr.msra.gmra.mrb[36].mxu1 %v1595_v10  ;;  %v1461_v10 = vld [vmem:[#allocation5 + $0xc8] sm:$0xff] }
 0x30d   :  { %1702 = vmatpush1.bf16.msra.mxu1 %v1436_v15  ;;  %1733 = vmatprep.mubr.bf16.mxu1 %v2859_v13  ;;  %v1460_v15 = vld [vmem:[#allocation5 + $0xc0] sm:$0xff] }
 0x30e   :  { %1703 = vmatprep.subr.bf16.mxu1 %v1439_v17  ;;  %1612 = vmatpush1.bf16.msra.mxu0 %v1503_v39  ;;  %v1463_v17 = vld [vmem:[#allocation5 + $0xd8] sm:$0xff]  ;;  %v1466_v39 = vld [vmem:[#allocation5 + $0xf0] sm:$0xff] }
 0x30f   :  { %1613 = vmatprep.subr.bf16.mxu0 %v1506_v51  ;;  %v1570_v51 = vrot.slane %v1568_v35, 1  ;;  %v1816_v35 = vld [vmem:[#allocation5 + $0x3d0] sm:$0xff] }
 0x311   :  { %1704 = vmatpush1.bf16.msra.mxu1 %v1438_v20  ;;  %v1462_v20 = vld [vmem:[#allocation5 + $0xd0] sm:$0xff] }
 0x312   :  { %1705 = vmatprep.subr.bf16.mxu1 %v1441_v22  ;;  %1614 = vmatpush1.bf16.msra.mxu0 %v1505_v31  ;;  %v1465_v22 = vld [vmem:[#allocation5 + $0xe8] sm:$0xff] }
 0x313   :  { %1615 = vmatprep.subr.bf16.mxu0 %v1508_v43  ;;  %v1471_v43 = vld [vmem:[#allocation5 + $0x118] sm:$0xff] }
 0x315   :  { %1706 = vmatpush1.bf16.msra.mxu1 %v1440_v24  ;;  %v2874_v24 = vcombine.high %v1488_v44, %v1488_v44  ;;  %v1470_v44 = vld [vmem:[#allocation5 + $0x110] sm:$0xff] }
 0x316   :  { %1707 = vmatprep.subr.bf16.mxu1 %v1443_v26  ;;  %1616 = vmatpush1.bf16.msra.mxu0 %v1507_v49  ;;  %v1575_v26 = vshll.u32 %v2859_v13, 16  ;;  %v1474_v49 = vld [vmem:[#allocation5 + $0x130] sm:$0xff] }
 0x317   :  { %1617 = vmatprep.subr.bf16.mxu0 %v1510_v53  ;;  %v1580_v33 = vshll.u32 %v2874_v24, 16  ;;  %v1476_v53 = vld [vmem:[#allocation5 + $0x140] sm:$0xff] }
 0x319   :  { %1708 = vmatpush1.bf16.msra.mxu1 %v1442_v28  ;;  %v1522_v28 = vld [vmem:[#allocation5 + $0x278] sm:$0xff] }
 0x31a   :  { %1709 = vmatprep.subr.bf16.mxu1 %v1445_v63  ;;  %1618 = vmatpush1.bf16.msra.mxu0 %v1509_v61  ;;  %v1467_v63 = vld [vmem:[#allocation5 + $0xf8] sm:$0xff]  ;;  %v1480_v61 = vld [vmem:[#allocation5 + $0x160] sm:$0xff] }
 0x31b   :  { %1619 = vmatprep.subr.bf16.mxu0 %v1512_v62  ;;  %v1483_v62 = vld [vmem:[#allocation5 + $0x178] sm:$0xff] }
 0x31d   :  { %1710 = vmatpush1.bf16.msra.mxu1 %v1444_v30  ;;  %v1577_v30 = vrot.slane %v1575_v26, 1  ;;  %v1806_v26 = vld [vmem:[#allocation5 + $0x380] sm:$0xff] }
 0x31e   :  { %1711 = vmatprep.subr.bf16.mxu1 %v1447_v34  ;;  %1620 = vmatpush1.bf16.msra.mxu0 %v1511_v3  ;;  %v1561_v34 = vshrl.u32 %v2194_v23, 16 }
 0x31f   :  { %1621 = vmatprep.subr.bf16.mxu0 %v1514_v5  ;;  %v1578_v37 = vor.u32 %v1577_v30, %v1573_v29  ;;  %v1791_v5 = vld [vmem:[#allocation5 + $0x308] sm:$0xff]  ;;  %v1813_v29 = vld [vmem:[#allocation5 + $0x3b8] sm:$0xff]  ;;  %v1812_v30 = vld [vmem:[#allocation5 + $0x3b0] sm:$0xff] }
 0x321   :  { %1712 = vmatpush1.bf16.msra.mxu1 %v1446_v36  ;;  %v1521_v36 = vld [vmem:[#allocation5 + $0x270] sm:$0xff] }
 0x322   :  { %1713 = vmatprep.subr.bf16.mxu1 %v1449_v38  ;;  %1622 = vmatpush1.bf16.msra.mxu0 %v1513_v32  ;;  %v1582_v38 = vrot.slane %v1580_v33, 1  ;;  %v1790_v32 = vld [vmem:[#allocation5 + $0x300] sm:$0xff]  ;;  %v1815_v33 = vld [vmem:[#allocation5 + $0x3c8] sm:$0xff] }
 0x323   :  { %1623 = vmatprep.subr.bf16.mxu0 %v1516_v12  ;;  %v1793_v12 = vld [vmem:[#allocation5 + $0x318] sm:$0xff] }
 0x324   :  { %v1583_v31 = vsel %vm130_vm3, %v1578_v37, %v1582_v38  ;;  %v1818_v37 = vld [vmem:[#allocation5 + $0x3e0] sm:$0xff]  ;;  %v1821_v38 = vld [vmem:[#allocation5 + $0x3f8] sm:$0xff] }
 0x325   :  { %1714 = vmatpush1.bf16.msra.mxu1 %v1448_v40  ;;  %v1566_v40 = vor.u32 %v1565_v8, %v1561_v34  ;;  %1631 = vmatprep.mubr.bf16.mxu0 %v1583_v31  ;;  %v1814_v34 = vld [vmem:[#allocation5 + $0x3c0] sm:$0xff]  ;;  %v1817_v8 = vld [vmem:[#allocation5 + $0x3d8] sm:$0xff]  ;;  %v1824_v31 = vld [vmem:[#allocation5 + $0x410] sm:$0xff] }
 0x326   :  { %1715 = vmatprep.subr.bf16.mxu1 %v1451_v41  ;;  %1624 = vmatpush1.bf16.msra.mxu0 %v1515_v14  ;;  %v1469_v41 = vld [vmem:[#allocation5 + $0x108] sm:$0xff]  ;;  %v1797_v14 = vld [vmem:[#allocation5 + $0x338] sm:$0xff] }
 0x327   :  { %1625 = vmatprep.subr.bf16.mxu0 %v1518_v16  ;;  %v1571_v13 = vsel %vm130_vm3, %v1566_v40, %v1570_v51  ;;  %v1799_v16 = vld [vmem:[#allocation5 + $0x348] sm:$0xff]  ;;  %v1822_v51 = vld [vmem:[#allocation5 + $0x400] sm:$0xff] }
 0x328   :  { %v1823_v40 = vld [vmem:[#allocation5 + $0x408] sm:$0xff] }
 0x329   :  { %1716 = vmatpush1.bf16.msra.mxu1 %v1450_v42  ;;  %v1468_v42 = vld [vmem:[#allocation5 + $0x100] sm:$0xff] }
 0x32a   :  { %1717 = vmatprep.subr.bf16.mxu1 %v1453_v45  ;;  %1626 = vmatpush1.bf16.msra.mxu0 %v1517_v18  ;;  %v1473_v45 = vld [vmem:[#allocation5 + $0x128] sm:$0xff]  ;;  %v1801_v18 = vld [vmem:[#allocation5 + $0x358] sm:$0xff] }
 0x32b   :  { %1627 = vmatprep.subr.bf16.mxu0 %v1520_v21  ;;  %v1803_v21 = vld [vmem:[#allocation5 + $0x368] sm:$0xff] }
 0x32d   :  { %1718 = vmatpush1.bf16.msra.mxu1 %v1452_v52  ;;  %v1477_v52 = vld [vmem:[#allocation5 + $0x148] sm:$0xff] }
 0x32e   :  { %1719 = vmatprep.subr.bf16.mxu1 %v1455_v19  ;;  %1628 = vmatpush1.bf16.msra.mxu0 %v1519_v25  ;;  %v1481_v19 = vld [vmem:[#allocation5 + $0x168] sm:$0xff] }
 0x32f   :  { %1629 = vmatprep.subr.bf16.mxu0 %v1522_v28  ;;  %v1807_v25 = vld [vmem:[#allocation5 + $0x388] sm:$0xff]  ;;  %v1808_v28 = vld [vmem:[#allocation5 + $0x390] sm:$0xff] }
 0x331   :  { %1720 = vmatpush1.bf16.msra.mxu1 %v1454_v55  ;;  %v2198_v55 = vcombine.high %v2862_v46, %v2854_v57  ;;  %v1792_v57 = vld [vmem:[#allocation5 + $0x310] sm:$0xff]  ;;  %v1795_v46 = vld [vmem:[#allocation5 + $0x328] sm:$0xff] }
 0x332   :  { %1721 = vmatprep.subr.bf16.mxu1 %v1457_v2  ;;  %1630 = vmatpush1.bf16.msra.mxu0 %v1521_v36  ;;  %v1482_v2 = vld [vmem:[#allocation5 + $0x170] sm:$0xff]  ;;  %v1819_v36 = vld [vmem:[#allocation5 + $0x3e8] sm:$0xff] }
 0x333   :  { %v1849_v3 = vrot.slane %v2198_v55, 1 }
 0x335   :  { %1722 = vmatpush1.bf16.msra.mxu1 %v1456_v4  ;;  %1632 = vmatmul.mubr.bf16.vlgmr.msra.gmra.mrb[8].mxu0 %v1571_v13  ;;  %v1850_v4 = vrot.slane %v2874_v24, 1  ;;  %v1804_v24 = vld [vmem:[#allocation5 + $0x370] sm:$0xff]  ;;  %v1827_v13 = vld [vmem:[#allocation5 + $0x428] sm:$0xff] }
 0x336   :  { %1723 = vmatprep.subr.bf16.mxu1 %v1459_v6  ;;  %v2518_v6 = vld [vmem:[#allocation3 + $0x8] ss:$12 sps:$4 sm:$0xff]  }
 0x339   :  { %1724 = vmatpush1.bf16.msra.mxu1 %v1458_v11  ;;  %v1851_v11 = vsel %vm398_vm5, %v1849_v3, %v1850_v4 }
 0x33a   :  { %1725 = vmatprep.subr.bf16.mxu1 %v1461_v10  ;;  %v1794_v10 = vld [vmem:[#allocation5 + $0x320] sm:$0xff] }
 0x33d   :  { %1726 = vmatpush1.bf16.msra.mxu1 %v1460_v15  ;;  %v1796_v15 = vld [vmem:[#allocation5 + $0x330] sm:$0xff] }
 0x33e   :  { %1727 = vmatprep.subr.bf16.mxu1 %v1463_v17  ;;  %v1798_v17 = vld [vmem:[#allocation5 + $0x340] sm:$0xff] }
 0x341   :  { %1728 = vmatpush1.bf16.msra.mxu1 %v1462_v20  ;;  %v1800_v20 = vld [vmem:[#allocation5 + $0x350] sm:$0xff] }
 0x342   :  { %1729 = vmatprep.subr.bf16.mxu1 %v1465_v22  ;;  %v1802_v22 = vld [vmem:[#allocation5 + $0x360] sm:$0xff] }
 0x345   :  { %1730 = vmatpush1.bf16.msra.mxu1 %v1464_v27  ;;  %v1809_v27 = vld [vmem:[#allocation5 + $0x398] sm:$0xff] }
 0x346   :  { %1731 = vmatprep.subr.bf16.mxu1 %v1467_v63  ;;  %v1810_v63 = vld [vmem:[#allocation5 + $0x3a0] sm:$0xff] }
 0x349   :  { %1732 = vmatpush1.bf16.msra.mxu1 %v1466_v39  ;;  %v1820_v39 = vld [vmem:[#allocation5 + $0x3f0] sm:$0xff] }
 0x34a   :  { %1744 = vmatprep.subr.bf16.mxu1 %v1469_v41  ;;  %v1825_v41 = vld [vmem:[#allocation5 + $0x418] sm:$0xff] }
 0x34c   :  { %1734 = vmatmul.mubr.bf16.vlgmr.msra.gmra.mrb[36].mxu1 %v2194_v23  ;;  %v1805_v23 = vld [vmem:[#allocation5 + $0x378] sm:$0xff] }
 0x34d   :  { %1745 = vmatpush1.bf16.msra.mxu1 %v1468_v42  ;;  %1776 = vmatprep.mubr.bf16.mxu1 %v2556_v1  ;;  %v1826_v42 = vld [vmem:[#allocation5 + $0x420] sm:$0xff] }
 0x34e   :  { %1746 = vmatprep.subr.bf16.mxu1 %v1471_v43  ;;  %v1829_v43 = vld [vmem:[#allocation5 + $0x438] sm:$0xff] }
 0x351   :  { %1747 = vmatpush1.bf16.msra.mxu1 %v1470_v44  ;;  %v1828_v44 = vld [vmem:[#allocation5 + $0x430] sm:$0xff] }
 0x352   :  { %1748 = vmatprep.subr.bf16.mxu1 %v1473_v45  ;;  %v1831_v45 = vld [vmem:[#allocation5 + $0x448] sm:$0xff] }
 0x355   :  { %1749 = vmatpush1.bf16.msra.mxu1 %v1472_v47  ;;  %v1830_v47 = vld [vmem:[#allocation5 + $0x440] sm:$0xff] }
 0x356   :  { %1750 = vmatprep.subr.bf16.mxu1 %v1475_v48  ;;  %v1833_v48 = vld [vmem:[#allocation5 + $0x458] sm:$0xff] }
 0x359   :  { %1751 = vmatpush1.bf16.msra.mxu1 %v1474_v49  ;;  %v1788_v49 = vld [vmem:[#allocation3 + $0x8] sm:$0xe] }
 0x35a   :  { %1752 = vmatprep.subr.bf16.mxu1 %v1477_v52  ;;  %v2199_v52 = vcombine.low %v1788_v49, %v2846_v50  ;;  %v1431_v50 = vld [vmem:[%s2921_s2 + $0x6] sm:$0x3] }
 0x35d   :  { %1753 = vmatpush1.bf16.msra.mxu1 %v1476_v53  ;;  %v1834_v53 = vld [vmem:[#allocation5 + $0x460] sm:$0xff] }
 0x35e   :  { %1754 = vmatprep.subr.bf16.mxu1 %v1479_v54  ;;  %v1837_v54 = vld [vmem:[#allocation5 + $0x478] sm:$0xff] }
 0x361   :  { %1755 = vmatpush1.bf16.msra.mxu1 %v1478_v58  ;;  %v1852_v58 = vrot.slane %v2199_v52, 1 }
 0x362   :  { %1756 = vmatprep.subr.bf16.mxu1 %v1481_v19  ;;  %v1853_v19 = vrot.slane %v2849_v59, 1 }
 0x364   :  { %v1854_v55 = vsel %vm398_vm5, %v1852_v58, %v1853_v19 }
 0x365   :  { %1757 = vmatpush1.bf16.msra.mxu1 %v1480_v61  ;;  %v1836_v61 = vld [vmem:[#allocation5 + $0x470] sm:$0xff] }
 0x366   :  { %1758 = vmatprep.subr.bf16.mxu1 %v1483_v62 }
 0x369   :  { %1759 = vmatpush1.bf16.msra.mxu1 %v1482_v2 }
 0x36a   :  { %1858 = vmatprep.subr.bf16.mxu1 %v1791_v5  ;;  %v1952_v5 = vrot.slane %v1431_v50, %v2736_v7 }
 0x36c   :  { %1777 = vmatmul.mubr.bf16.vlgmr.msra.gmra.mrb[36].mxu1 %v2518_v6 }
 0x36d   :  { %1859 = vmatpush1.bf16.msra.mxu1 %v1790_v32  ;;  %1890 = vmatprep.mubr.bf16.mxu1 %v1851_v11  ;;  %v1956_v32 = vrot.slane %v1431_v50, %v2739_v9 }
 0x36e   :  { %1860 = vmatprep.subr.bf16.mxu1 %v1793_v12 }
 0x371   :  { %1861 = vmatpush1.bf16.msra.mxu1 %v1792_v57 }
 0x372   :  { %1862 = vmatprep.subr.bf16.mxu1 %v1795_v46 }
 0x375   :  { %1863 = vmatpush1.bf16.msra.mxu1 %v1794_v10 }
 0x376   :  { %1864 = vmatprep.subr.bf16.mxu1 %v1797_v14 }
 0x379   :  { %1865 = vmatpush1.bf16.msra.mxu1 %v1796_v15 }
 0x37a   :  { %1866 = vmatprep.subr.bf16.mxu1 %v1799_v16 }
 0x37d   :  { %1867 = vmatpush1.bf16.msra.mxu1 %v1798_v17 }
 0x37e   :  { %1868 = vmatprep.subr.bf16.mxu1 %v1801_v18 }
 0x381   :  { %1869 = vmatpush1.bf16.msra.mxu1 %v1800_v20 }
 0x382   :  { %1870 = vmatprep.subr.bf16.mxu1 %v1803_v21 }
 0x385   :  { %1871 = vmatpush1.bf16.msra.mxu1 %v1802_v22 }
 0x386   :  { %1872 = vmatprep.subr.bf16.mxu1 %v1805_v23 }
 0x389   :  { %1873 = vmatpush1.bf16.msra.mxu1 %v1804_v24 }
 0x38a   :  { %1874 = vmatprep.subr.bf16.mxu1 %v1807_v25 }
 0x38d   :  { %1875 = vmatpush1.bf16.msra.mxu1 %v1806_v26 }
 0x38e   :  { %1876 = vmatprep.subr.bf16.mxu1 %v1809_v27 }
 0x391   :  { %1877 = vmatpush1.bf16.msra.mxu1 %v1808_v28 }
 0x392   :  { %1878 = vmatprep.subr.bf16.mxu1 %v1811_v56 }
 0x395   :  { %1879 = vmatpush1.bf16.msra.mxu1 %v1810_v63 }
 0x396   :  { %1880 = vmatprep.subr.bf16.mxu1 %v1813_v29 }
 0x399   :  { %1881 = vmatpush1.bf16.msra.mxu1 %v1812_v30 }
 0x39a   :  { %1882 = vmatprep.subr.bf16.mxu1 %v1815_v33 }
 0x39d   :  { %1883 = vmatpush1.bf16.msra.mxu1 %v1814_v34 }
 0x39e   :  { %1884 = vmatprep.subr.bf16.mxu1 %v1817_v8 }
 0x3a1   :  { %1885 = vmatpush1.bf16.msra.mxu1 %v1816_v35 }
 0x3a2   :  { %1886 = vmatprep.subr.bf16.mxu1 %v1819_v36 }
 0x3a5   :  { %1887 = vmatpush1.bf16.msra.mxu1 %v1818_v37 }
 0x3a6   :  { %1888 = vmatprep.subr.bf16.mxu1 %v1821_v38 }
 0x3a9   :  { %1889 = vmatpush1.bf16.msra.mxu1 %v1820_v39 }
 0x3aa   :  { %1901 = vmatprep.subr.bf16.mxu1 %v1823_v40 }
 0x3ac   :  { %1891 = vmatmul.mubr.bf16.vlgmr.msra.gmra.mrb[36].mxu1 %v2870_v60  ;;  %v1832_v60 = vld [vmem:[#allocation5 + $0x450] sm:$0xff] }
 0x3ad   :  { %1902 = vmatpush1.bf16.msra.mxu1 %v1822_v51  ;;  %1933 = vmatprep.mubr.bf16.mxu1 %v2556_v1  ;;  %v1835_v1 = vld [vmem:[#allocation5 + $0x468] sm:$0xff] }
 0x3ae   :  { %1903 = vmatprep.subr.bf16.mxu1 %v1825_v41 }
 0x3b1   :  { %1904 = vmatpush1.bf16.msra.mxu1 %v1824_v31 }
 0x3b2   :  { %1905 = vmatprep.subr.bf16.mxu1 %v1827_v13 }
 0x3b5   :  { %1906 = vmatpush1.bf16.msra.mxu1 %v1826_v42 }
 0x3b6   :  { %1907 = vmatprep.subr.bf16.mxu1 %v1829_v43 }
 0x3b9   :  { %1908 = vmatpush1.bf16.msra.mxu1 %v1828_v44 }
 0x3ba   :  { %1909 = vmatprep.subr.bf16.mxu1 %v1831_v45 }
 0x3bd   :  { %1910 = vmatpush1.bf16.msra.mxu1 %v1830_v47 }
 0x3be   :  { %1911 = vmatprep.subr.bf16.mxu1 %v1833_v48 }
 0x3c1   :  { %1912 = vmatpush1.bf16.msra.mxu1 %v1832_v60 }
 0x3c2   :  { %1913 = vmatprep.subr.bf16.mxu1 %v1835_v1 }
 0x3c5   :  { %1914 = vmatpush1.bf16.msra.mxu1 %v1834_v53 }
 0x3c6   :  { %1915 = vmatprep.subr.bf16.mxu1 %v1837_v54 }
 0x3c9   :  { %1916 = vmatpush1.bf16.msra.mxu1 %v1836_v61 }
 0x3cc   :  { %1934 = vmatmul.mubr.bf16.vlgmr.msra.gmra.mrb[36].mxu1 %v1854_v55 }
 0x408   :  { %v1633_v62 = vpop.f32.mrb[8].mxu0 }
 0x409   :  { %v1635_v2 = vpop.f32.mrb[9].mxu0 }
 0x40a   :  { %v1637_v3 = vpop.f32.mrb[10].mxu0 }
 0x40b   :  { %v1639_v4 = vpop.f32.mrb[11].mxu0 }
 0x49f   :  { %v1935_v6 = vpop.f32.mrb[36].mxu1 }
 0x4a0   :  { %v2414_v59 = vadd.f32 %v1935_v6, %v1633_v62  ;;  %v1937_v11 = vpop.f32.mrb[37].mxu1 }
 0x4a1   :  { %v2415_v12 = vadd.f32 %v1937_v11, %v1635_v2  ;;  %v1939_v57 = vpop.f32.mrb[38].mxu1 }
 0x4a2   :  { %v1959_v46 = vadd.f32 %v2414_v59, %v1952_v5  ;;  %v2416_v10 = vadd.f32 %v1939_v57, %v1637_v3  ;;  %v1941_v14 = vpop.f32.mrb[39].mxu1 }
 0x4a3   :  { %v1960_v15 = vadd.f32 %v2415_v12, %v1956_v32  ;;  %v2417_v16 = vadd.f32 %v1941_v14, %v1639_v4 }
 0x4a4   :  { %v1963_v17 = vmax.f32 %v1959_v46, 0.0  ;;  %v1961_v18 = vadd.f32 %v2416_v10, %v1952_v5 }
 0x4a5   :  { %v1964_v20 = vmax.f32 %v1960_v15, 0.0  ;;  %v1962_v21 = vadd.f32 %v2417_v16, %v1956_v32 }
 0x4a6   :  { %v1965_v22 = vmax.f32 %v1961_v18, 0.0 }
 0x4a7   :  { %v1966_v23 = vmax.f32 %v1962_v21, 0.0 }
 0x4a8   :  { %2550 = dma.done.wait [#allocation7 + $0x2], 3072 }
 0x4a9   :  { %2551 = vsyncadd [#allocation7 + $0x2], 4294964224  ;;  %v1972_v7 = vpack.c.bf16 %v1966_v23, %v1964_v20  ;;  %v1981_v9 = vld [vmem:[#allocation6 + $0x40] sm:$0xff]  ;;  %v1982_v25 = vld [vmem:[#allocation6 + $0x48] sm:$0xff]  ;;  %v1971_v38 = vpack.c.bf16 %v1965_v22, %v1963_v17 }
 0x4aa   :  { %v1973_v24 = vld [vmem:[#allocation6] sm:$0xff]  ;;  %2303 = vmatprep.subr.bf16.mxu0 %v1981_v9  ;;  %v1974_v26 = vld [vmem:[#allocation6 + $0x8] sm:$0xff]  ;;  %v1983_v27 = vld [vmem:[#allocation6 + $0x50] sm:$0xff] }
 0x4ab   :  { %2028 = vmatprep.mubr.bf16.mxu0 %v1972_v7  ;;  %2304 = vmatpush3.bf16.msra.mxu0 %v1973_v24  ;;  %v1975_v28 = vld [vmem:[#allocation6 + $0x10] sm:$0xff]  ;;  %v1984_v56 = vld [vmem:[#allocation6 + $0x58] sm:$0xff]  ;;  %v1985_v29 = vld [vmem:[#allocation6 + $0x60] sm:$0xff] }
 0x4ac   :  { %2305 = vmatprep.subr.bf16.mxu0 %v1982_v25  ;;  %v1976_v63 = vld [vmem:[#allocation6 + $0x18] sm:$0xff]  ;;  %v1977_v30 = vld [vmem:[#allocation6 + $0x20] sm:$0xff]  ;;  %v1986_v33 = vld [vmem:[#allocation6 + $0x68] sm:$0xff] }
 0x4ad   :  { %v1978_v34 = vld [vmem:[#allocation6 + $0x28] sm:$0xff]  ;;  %v1987_v8 = vld [vmem:[#allocation6 + $0x70] sm:$0xff]  ;;  %v1988_v36 = vld [vmem:[#allocation6 + $0x78] sm:$0xff] }
 0x4ae   :  { %v1979_v35 = vld [vmem:[#allocation6 + $0x30] sm:$0xff]  ;;  %v1980_v37 = vld [vmem:[#allocation6 + $0x38] sm:$0xff]  ;;  %v2040_v39 = vld [vmem:[#allocation6 + $0x80] sm:$0xff] }
 0x4af   :  { %2306 = vmatpush3.bf16.msra.mxu0 %v1974_v26  ;;  %v2041_v40 = vld [vmem:[#allocation6 + $0x88] sm:$0xff]  ;;  %v2042_v51 = vld [vmem:[#allocation6 + $0x90] sm:$0xff]  ;;  %v2043_v41 = vld [vmem:[#allocation6 + $0x98] sm:$0xff] }
 0x4b0   :  { %2307 = vmatprep.subr.bf16.mxu0 %v1983_v27  ;;  %v2044_v31 = vld [vmem:[#allocation6 + $0xa0] sm:$0xff]  ;;  %v2045_v13 = vld [vmem:[#allocation6 + $0xa8] sm:$0xff]  ;;  %v2046_v42 = vld [vmem:[#allocation6 + $0xb0] sm:$0xff] }
 0x4b1   :  { %v2047_v43 = vld [vmem:[#allocation6 + $0xb8] sm:$0xff]  ;;  %v2200_v45 = vld [vmem:[%s2921_s2 + $0x8] ss:$0 sm:$0xff] }
 0x4b3   :  { %2308 = vmatpush3.bf16.msra.mxu0 %v1975_v28 }
 0x4b4   :  { %2309 = vmatprep.subr.bf16.mxu0 %v1984_v56 }
 0x4b7   :  { %2310 = vmatpush3.bf16.msra.mxu0 %v1976_v63 }
 0x4b8   :  { %2311 = vmatprep.subr.bf16.mxu0 %v1985_v29 }
 0x4bb   :  { %2312 = vmatpush3.bf16.msra.mxu0 %v1977_v30 }
 0x4bc   :  { %2313 = vmatprep.subr.bf16.mxu0 %v1986_v33 }
 0x4bf   :  { %2314 = vmatpush3.bf16.msra.mxu0 %v1978_v34 }
 0x4c0   :  { %2315 = vmatprep.subr.bf16.mxu0 %v1987_v8 }
 0x4c3   :  { %2316 = vmatpush3.bf16.msra.mxu0 %v1979_v35 }
 0x4c4   :  { %2317 = vmatprep.subr.bf16.mxu0 %v1988_v36 }
 0x4c7   :  { %2318 = vmatpush3.bf16.msra.mxu0 %v1980_v37 }
 0x4c8   :  { %2394 = vmatprep.subr.bf16.mxu0 %v2553_v0 }
 0x4ca   :  { %2029 = vmatmul.mubr.bf16.vlgmr.msra.gmra.mrb[12].mxu0 %v1971_v38 }
 0x4cb   :  { %2395 = vmatpush3.bf16.msra.mxu0 %v2040_v39  ;;  %2410 = vmatprep.mubr.msk.bf16.mxu0 %vm2555_vm0, %v2553_v0 }
 0x4cc   :  { %2396 = vmatprep.subr.bf16.mxu0 %v2553_v0 }
 0x4cf   :  { %2397 = vmatpush3.bf16.msra.mxu0 %v2041_v40 }
 0x4d0   :  { %2398 = vmatprep.subr.bf16.mxu0 %v2553_v0 }
 0x4d3   :  { %2399 = vmatpush3.bf16.msra.mxu0 %v2042_v51 }
 0x4d4   :  { %2400 = vmatprep.subr.bf16.mxu0 %v2553_v0 }
 0x4d7   :  { %2401 = vmatpush3.bf16.msra.mxu0 %v2043_v41 }
 0x4d8   :  { %2402 = vmatprep.subr.bf16.mxu0 %v2553_v0 }
 0x4db   :  { %2403 = vmatpush3.bf16.msra.mxu0 %v2044_v31 }
 0x4dc   :  { %2404 = vmatprep.subr.bf16.mxu0 %v2553_v0 }
 0x4df   :  { %2405 = vmatpush3.bf16.msra.mxu0 %v2045_v13 }
 0x4e0   :  { %2406 = vmatprep.subr.bf16.mxu0 %v2553_v0 }
 0x4e3   :  { %2407 = vmatpush3.bf16.msra.mxu0 %v2046_v42 }
 0x4e4   :  { %2408 = vmatprep.subr.bf16.mxu0 %v2553_v0  ;;  %v2201_v0 = vld [vmem:[%s2921_s2 + $0x9] ss:$0 sm:$0xff] }
 0x4e7   :  { %2409 = vmatpush3.bf16.msra.mxu0 %v2047_v43 }
 0x59d   :  { %v2319_v44 = vpop.f32.mrb[12].mxu0 }
 0x59e   :  { %v2320_v47 = vpop.f32.mrb[13].mxu0 }
 0x59f   :  { %v2321_v48 = vadd.f32 %v2320_v47, %v2319_v44  ;;  %v2322_v60 = vpop.f32.mrb[14].mxu0 }
 0x5a0   :  { %v2323_v49 = vpop.f32.mrb[15].mxu0 }
 0x5a1   :  { %v2031_v1 = vadd.f32 %v2321_v48, %v2200_v45  ;;  %v2324_v52 = vadd.f32 %v2323_v49, %v2322_v60 }
 0x5a3   :  { %v2034_v53 = vadd.f32 %v2324_v52, %v2200_v45  ;;  %v2037_v54 = vmax.f32 %v2031_v1, 0.0 }
 0x5a5   :  { %v2038_v58 = vmax.f32 %v2034_v53, 0.0 }
 0x5a7   :  { %v2039_v19 = vpack.c.bf16 %v2038_v58, %v2037_v54 }
 0x5a9   :  { %2411 = vmatmul.mubr.bf16.vlgmr.msra.gmra.mrb[16].mxu0 %v2039_v19 }
 0x67c   :  { %v2089_v61 = vpop.f32.mrb[16].mxu0 }
 0x67d   :  { %v2090_v55 = vadd.f32 %v2201_v0, %v2089_v61  ;;  %v2412_v62 = vpop.f32.mrb[17].mxu0 }
 0x67e   :  { %v2092_v2 = vpop.f32.mrb[18].mxu0 }
 0x67f   :  { %2096 = vst [vmem:[%s2925_s6] sm:$0xff] %v2090_v55  ;;  %v2093_v3 = vadd.f32 %v2201_v0, %v2092_v2  ;;  %v2413_v4 = vpop.f32.mrb[19].mxu0 }
 0x681   :  { %2097 = vst [vmem:[%s2925_s6 + $0x8] sm:$0xff] %v2093_v3 }
 0x682   :  { %2102 = vsyncmov [#allocation7] }
 0x685   :  { %s2103_s27 = vpop.sfrf %2102 }
 0x686   :  { %p2202_p8 = scmp.ne.s32.totalorder %s2103_s27, 0 }
 0x688   :  { %2107 = shalt.err (%p2202_p8)  }
 0x689   :  { %2109 = vsyncmov [#allocation7 + $0x1] }
 0x68c   :  { %s2110_s2 = vpop.sfrf %2109 }
 0x68d   :  { %p2203_p9 = scmp.ne.s32.totalorder %s2110_s2, 0 }
 0x68f   :  { %2114 = shalt.err (%p2203_p9)  }
 0x690   :  { %2116 = vsyncmov [#allocation7 + $0x2] }
 0x693   :  { %s2117_s0 = vpop.sfrf %2116 }
 0x694   :  { %p2204_p10 = scmp.ne.s32.totalorder %s2117_s0, 0 }
 0x696   :  { %2121 = shalt.err (%p2204_p10)  }

</bundles_post_ra>
